<compile_context>
chip_gen: v6e
topology: v6e:2x2x1
jax: 0.10.0
libtpu: 0.0.40
codegen_flags: <defaults>
</compile_context>

<pallas_src>
import functools

import jax
import jax.numpy as jnp
import numpy as np
from jax.experimental import pallas as pl
from jax.experimental.pallas import tpu as pltpu

EPS = 1e-5  # BatchNorm2d default eps


# ---------------------------------------------------------------------------
# Fused conv (channel contraction) + BatchNorm(train) + ReLU  Pallas kernel
# ---------------------------------------------------------------------------
def _conv_bn_relu_kernel(x_ref, w_ref, g_ref, b_ref, o_ref, r_ref,
                         *, inv_count, pad_count):
    """x:(K,M) w:(Co,K) gamma/beta:(Co,1) -> o:(Co,M)=relu(bn(w@x)), r:(Co,1).

    `inv_count` = 1 / (number of output pixels the BN statistics run over,
    including the conv's zero-padding ring).  `pad_count` = number of those
    pixels that are ring pixels (pre-BN value exactly 0 since the conv bias is
    dropped).  `r` is the post-BN/ReLU value of such a ring pixel.
    """
    x = x_ref[...]                       # (K, M)   lane axis = pixels
    w = w_ref[...]                       # (Co, K)
    co, k = w.shape

    # Tiny channel contraction (K <= 36) on the VPU as unrolled broadcast-FMAs;
    # the MXU would be starved at these channel counts.
    y = w[:, 0:1] * x[0:1, :]            # (Co, M)
    for kk in range(1, k):
        y = y + w[:, kk:kk + 1] * x[kk:kk + 1, :]

    # BatchNorm training statistics over ALL output pixels (interior + ring).
    # Ring pixels are 0 pre-BN: they add nothing to the sum and exactly
    # pad_count * mean^2 to the centered sum of squares.
    mean = jnp.sum(y, axis=1, keepdims=True) * inv_count            # (Co, 1)
    d = y - mean
    var = (jnp.sum(d * d, axis=1, keepdims=True)
           + pad_count * mean * mean) * inv_count                   # biased var
    scale = g_ref[...] * jax.lax.rsqrt(var + EPS)
    shift = b_ref[...] - mean * scale

    o_ref[...] = jnp.maximum(y * scale + shift, 0.0)
    r_ref[...] = jnp.maximum(shift, 0.0)


def fused_conv_bn_relu(x2d, w2d, gamma2d, beta2d, *, padded_count):
    """Single-grid-step fused conv+BN+ReLU; everything resident in VMEM."""
    k, m = x2d.shape
    co = w2d.shape[0]
    kern = functools.partial(
        _conv_bn_relu_kernel,
        inv_count=1.0 / float(padded_count),
        pad_count=float(padded_count - m),
    )
    return pl.pallas_call(
        kern,
        out_shape=(
            jax.ShapeDtypeStruct((co, m), jnp.float32),
            jax.ShapeDtypeStruct((co, 1), jnp.float32),
        ),
        grid_spec=pltpu.PrefetchScalarGridSpec(
            num_scalar_prefetch=0,
            grid=(1,),                                   # whole problem fits in VMEM
            in_specs=[
                pl.BlockSpec((k, m), lambda i: (0, 0)),
                pl.BlockSpec((co, k), lambda i: (0, 0)),
                pl.BlockSpec((co, 1), lambda i: (0, 0)),
                pl.BlockSpec((co, 1), lambda i: (0, 0)),
            ],
            out_specs=[
                pl.BlockSpec((co, m), lambda i: (0, 0)),
                pl.BlockSpec((co, 1), lambda i: (0, 0)),
            ],
        ),
        compiler_params=pltpu.CompilerParams(
            dimension_semantics=("arbitrary",),
        ),
    )(x2d, w2d, gamma2d, beta2d)


# ---------------------------------------------------------------------------
# Thin XLA glue between the fused kernels
# ---------------------------------------------------------------------------
def _splat_padded(o2d, ring, n, h, w):
    """(Co, n*h*w) interior + (Co,1) ring constant -> (Co, n, h+2, w+2)."""
    co = o2d.shape[0]
    o4 = o2d.reshape(co, n, h, w)
    full = jnp.broadcast_to(ring.reshape(co, 1, 1, 1), (co, n, h + 2, w + 2))
    return full.at[:, :, 1:h + 1, 1:w + 1].set(o4)


def _im2col3x3(a):
    """(Ci, N, H, W) -> (9*Ci, N*H*W) zero-padded 3x3 patches.

    Row ordering is ci*9 + dy*3 + dx, matching weight.reshape(Co, Ci*9) of an
    OIHW conv weight.
    """
    ci, n, h, w = a.shape
    ap = jnp.pad(a, ((0, 0), (0, 0), (1, 1), (1, 1)))
    cols = [ap[:, :, dy:dy + h, dx:dx + w] for dy in range(3) for dx in range(3)]
    x9 = jnp.stack(cols, axis=1)                       # (Ci, 9, N, H, W)
    return x9.reshape(ci * 9, n * h * w)


# ---------------------------------------------------------------------------
# C2f_v2 forward (Pallas)
# ---------------------------------------------------------------------------
def c2f_v2_forward(x, p):
    """Pallas forward for C2f_v2(c1, c2, n=1, shortcut=False, e=0.5)."""
    n, c1, h, w = x.shape
    c = p["cv0_w"].shape[0]
    c2 = p["cv2_w"].shape[0]
    hp, wp = h + 2, w + 2          # spatial after a padding=1 1x1 conv

    # channel-major activation: (C, N*H*W), pixels on the lane axis
    x2d = jnp.transpose(x, (1, 0, 2, 3)).astype(jnp.float32).reshape(c1, n * h * w)

    # ---- cv0 + cv1 fused (same input, stacked output channels) -------------
    w01 = jnp.concatenate([p["cv0_w"], p["cv1_w"]], axis=0).reshape(2 * c, c1)
    g01 = jnp.concatenate([p["cv0_gamma"], p["cv1_gamma"]]).reshape(2 * c, 1)
    b01 = jnp.concatenate([p["cv0_beta"], p["cv1_beta"]]).reshape(2 * c, 1)
    o01, r01 = fused_conv_bn_relu(x2d, w01, g01, b01, padded_count=n * hp * wp)
    y01 = _splat_padded(o01, r01, n, h, w)             # (2c, N, Hp, Wp) = [y0; y1]
    y1 = y01[c:]                                       # cv1 output

    # ---- bottleneck: two 3x3 (pad 1) Conv+BN+ReLU, shortcut=False ----------
    z1, _ = fused_conv_bn_relu(
        _im2col3x3(y1), p["m_c1_w"].reshape(c, c * 9),
        p["m_c1_gamma"].reshape(c, 1), p["m_c1_beta"].reshape(c, 1),
        padded_count=n * hp * wp)
    z1 = z1.reshape(c, n, hp, wp)

    y2, _ = fused_conv_bn_relu(
        _im2col3x3(z1), p["m_c2_w"].reshape(c, c * 9),
        p["m_c2_gamma"].reshape(c, 1), p["m_c2_beta"].reshape(c, 1),
        padded_count=n * hp * wp)
    y2 = y2.reshape(c, n, hp, wp)

    # ---- cv2 on the channel concat [y0, y1, y2] -----------------------------
    cat = jnp.concatenate([y01, y2], axis=0).reshape(3 * c, n * hp * wp)
    o2, r2 = fused_conv_bn_relu(
        cat, p["cv2_w"].reshape(c2, 3 * c),
        p["cv2_gamma"].reshape(c2, 1), p["cv2_beta"].reshape(c2, 1),
        padded_count=n * (hp + 2) * (wp + 2))
    out_cm = _splat_padded(o2, r2, n, hp, wp)          # (c2, N, Hp+2, Wp+2)
    return jnp.transpose(out_cm, (1, 0, 2, 3))         # back to NCHW


# ---------------------------------------------------------------------------
# Pure-JAX reference matching PyTorch (includes the conv bias to show that it
# is absorbed by training-mode BatchNorm).
# ---------------------------------------------------------------------------
def _conv_bn_relu_ref(x, w, bias, gamma, beta):
    y = jax.lax.conv_general_dilated(
        x, w, window_strides=(1, 1), padding=[(1, 1), (1, 1)],
        dimension_numbers=("NCHW", "OIHW", "NCHW"))
    y = y + bias.reshape(1, -1, 1, 1)
    mean = jnp.mean(y, axis=(0, 2, 3), keepdims=True)
    var = jnp.mean(jnp.square(y - mean), axis=(0, 2, 3), keepdims=True)
    y = (y - mean) * jax.lax.rsqrt(var + EPS)
    y = y * gamma.reshape(1, -1, 1, 1) + beta.reshape(1, -1, 1, 1)
    return jnp.maximum(y, 0.0)


def c2f_v2_reference(x, p):
    y0 = _conv_bn_relu_ref(x, p["cv0_w"], p["cv0_bias"], p["cv0_gamma"], p["cv0_beta"])
    y1 = _conv_bn_relu_ref(x, p["cv1_w"], p["cv1_bias"], p["cv1_gamma"], p["cv1_beta"])
    z1 = _conv_bn_relu_ref(y1, p["m_c1_w"], p["m_c1_bias"], p["m_c1_gamma"], p["m_c1_beta"])
    y2 = _conv_bn_relu_ref(z1, p["m_c2_w"], p["m_c2_bias"], p["m_c2_gamma"], p["m_c2_beta"])
    cat = jnp.concatenate([y0, y1, y2], axis=1)
    return _conv_bn_relu_ref(cat, p["cv2_w"], p["cv2_bias"], p["cv2_gamma"], p["cv2_beta"])


if __name__ == "__main__":
    # C2f_v2(c1=4, c2=8, n=1, shortcut=False, e=0.5)  =>  hidden c = 4.
    # Input (N, c1, H, W) = (2, 4, 16, 16); output (2, 8, 20, 20).
    N, C1, C2, H, W = 2, 4, 8, 16, 16
    c = C2 // 2

    key = jax.random.PRNGKey(0)
    ks = iter(jax.random.split(key, 16))

    params = {}
    for name, co, ci, kk in (("cv0", c, C1, 1), ("cv1", c, C1, 1),
                             ("m_c1", c, c, 3), ("m_c2", c, c, 3),
                             ("cv2", C2, 3 * c, 1)):
        params[f"{name}_w"] = 0.1 * jax.random.normal(
            next(ks), (co, ci, kk, kk), dtype=jnp.float32)
        # Conv bias is only used by the reference: it is absorbed by the
        # training-mode BatchNorm, so the Pallas kernels drop it.
        params[f"{name}_bias"] = 0.05 * jax.random.normal(
            next(ks), (co,), dtype=jnp.float32)
        params[f"{name}_gamma"] = jnp.ones((co,), jnp.float32)   # BN default weight
        params[f"{name}_beta"] = jnp.zeros((co,), jnp.float32)   # BN default bias

    x = jax.random.normal(next(ks), (N, C1, H, W), dtype=jnp.float32)

    out = jax.block_until_ready(jax.jit(c2f_v2_forward)(x, params))
    ref = jax.block_until_ready(c2f_v2_reference(x, params))

    assert out.shape == (N, C2, H + 4, W + 4), out.shape
    np.testing.assert_allclose(np.asarray(out), np.asarray(ref),
                               rtol=2e-4, atol=2e-4)
    print("KERNEL_OK")
</pallas_src>

<mosaic_0001>
module attributes {stable_mosaic.version = 11 : i64} {
  func.func @_conv_bn_relu_kernel(%arg0: i32, %arg1: memref<4x512xf32, #tpu.memory_space<vmem>>, %arg2: memref<8x4xf32, #tpu.memory_space<vmem>>, %arg3: memref<8x1xf32, #tpu.memory_space<vmem>>, %arg4: memref<8x1xf32, #tpu.memory_space<vmem>>, %arg5: memref<8x512xf32, #tpu.memory_space<vmem>>, %arg6: memref<8x1xf32, #tpu.memory_space<vmem>>) attributes {dimension_semantics = [#tpu.dimension_semantics<arbitrary>], iteration_bounds = array<i64: 1>, scalar_prefetch = 0 : i64, scratch_operands = 0 : i64, tpu.core_type = #tpu.core_type<tc>, window_params = [{pipeline_mode = #tpu.pipeline_mode<synchronous>, transform_indices = @transform_0, window_bounds = array<i64: 4, 512>}, {pipeline_mode = #tpu.pipeline_mode<synchronous>, transform_indices = @transform_1, window_bounds = array<i64: 8, 4>}, {pipeline_mode = #tpu.pipeline_mode<synchronous>, transform_indices = @transform_2, window_bounds = array<i64: 8, 1>}, {pipeline_mode = #tpu.pipeline_mode<synchronous>, transform_indices = @transform_3, window_bounds = array<i64: 8, 1>}, {pipeline_mode = #tpu.pipeline_mode<synchronous>, transform_indices = @transform_4, window_bounds = array<i64: 8, 512>}, {pipeline_mode = #tpu.pipeline_mode<synchronous>, transform_indices = @transform_5, window_bounds = array<i64: 8, 1>}]} {
    %c0 = arith.constant 0 : index
    %c0_0 = arith.constant 0 : index
    %0 = vector.load %arg1[%c0, %c0_0] : memref<4x512xf32, #tpu.memory_space<vmem>>, vector<4x512xf32>
    %c0_1 = arith.constant 0 : index
    %c0_2 = arith.constant 0 : index
    %1 = vector.load %arg2[%c0_1, %c0_2] : memref<8x4xf32, #tpu.memory_space<vmem>>, vector<8x4xf32>
    %2 = vector.extract_strided_slice %1 {offsets = [0, 0], sizes = [8, 1], strides = [1, 1]} : vector<8x4xf32> to vector<8x1xf32>
    %3 = vector.extract_strided_slice %0 {offsets = [0, 0], sizes = [1, 512], strides = [1, 1]} : vector<4x512xf32> to vector<1x512xf32>
    %4 = vector.broadcast %2 : vector<8x1xf32> to vector<8x512xf32>
    %5 = vector.broadcast %3 : vector<1x512xf32> to vector<8x512xf32>
    %6 = arith.mulf %4, %5 : vector<8x512xf32>
    %7 = vector.extract_strided_slice %1 {offsets = [0, 1], sizes = [8, 1], strides = [1, 1]} : vector<8x4xf32> to vector<8x1xf32>
    %8 = vector.extract_strided_slice %0 {offsets = [1, 0], sizes = [1, 512], strides = [1, 1]} : vector<4x512xf32> to vector<1x512xf32>
    %9 = vector.broadcast %7 : vector<8x1xf32> to vector<8x512xf32>
    %10 = vector.broadcast %8 : vector<1x512xf32> to vector<8x512xf32>
    %11 = arith.mulf %9, %10 : vector<8x512xf32>
    %12 = arith.addf %6, %11 : vector<8x512xf32>
    %13 = vector.extract_strided_slice %1 {offsets = [0, 2], sizes = [8, 1], strides = [1, 1]} : vector<8x4xf32> to vector<8x1xf32>
    %14 = vector.extract_strided_slice %0 {offsets = [2, 0], sizes = [1, 512], strides = [1, 1]} : vector<4x512xf32> to vector<1x512xf32>
    %15 = vector.broadcast %13 : vector<8x1xf32> to vector<8x512xf32>
    %16 = vector.broadcast %14 : vector<1x512xf32> to vector<8x512xf32>
    %17 = arith.mulf %15, %16 : vector<8x512xf32>
    %18 = arith.addf %12, %17 : vector<8x512xf32>
    %19 = vector.extract_strided_slice %1 {offsets = [0, 3], sizes = [8, 1], strides = [1, 1]} : vector<8x4xf32> to vector<8x1xf32>
    %20 = vector.extract_strided_slice %0 {offsets = [3, 0], sizes = [1, 512], strides = [1, 1]} : vector<4x512xf32> to vector<1x512xf32>
    %21 = vector.broadcast %19 : vector<8x1xf32> to vector<8x512xf32>
    %22 = vector.broadcast %20 : vector<1x512xf32> to vector<8x512xf32>
    %23 = arith.mulf %21, %22 : vector<8x512xf32>
    %24 = arith.addf %18, %23 : vector<8x512xf32>
    %cst = arith.constant dense<0.000000e+00> : vector<8xf32>
    %25 = vector.multi_reduction <add>, %24, %cst [1] : vector<8x512xf32> to vector<8xf32>
    %26 = vector.shape_cast %25 : vector<8xf32> to vector<8x1xf32>
    %cst_3 = arith.constant 0.00154320989 : f32
    %27 = vector.broadcast %cst_3 : f32 to vector<8x1xf32>
    %28 = arith.mulf %26, %27 : vector<8x1xf32>
    %29 = vector.broadcast %28 : vector<8x1xf32> to vector<8x512xf32>
    %30 = arith.subf %24, %29 : vector<8x512xf32>
    %31 = arith.mulf %30, %30 : vector<8x512xf32>
    %cst_4 = arith.constant dense<0.000000e+00> : vector<8xf32>
    %32 = vector.multi_reduction <add>, %31, %cst_4 [1] : vector<8x512xf32> to vector<8xf32>
    %33 = vector.shape_cast %32 : vector<8xf32> to vector<8x1xf32>
    %cst_5 = arith.constant 1.360000e+02 : f32
    %34 = vector.broadcast %cst_5 : f32 to vector<8x1xf32>
    %35 = arith.mulf %34, %28 : vector<8x1xf32>
    %36 = arith.mulf %35, %28 : vector<8x1xf32>
    %37 = arith.addf %33, %36 : vector<8x1xf32>
    %cst_6 = arith.constant 0.00154320989 : f32
    %38 = vector.broadcast %cst_6 : f32 to vector<8x1xf32>
    %39 = arith.mulf %37, %38 : vector<8x1xf32>
    %c0_7 = arith.constant 0 : index
    %c0_8 = arith.constant 0 : index
    %40 = vector.load %arg3[%c0_7, %c0_8] : memref<8x1xf32, #tpu.memory_space<vmem>>, vector<8x1xf32>
    %cst_9 = arith.constant 9.99999974E-6 : f32
    %41 = vector.broadcast %cst_9 : f32 to vector<8x1xf32>
    %42 = arith.addf %39, %41 : vector<8x1xf32>
    %43 = math.rsqrt %42 : vector<8x1xf32>
    %44 = arith.mulf %40, %43 : vector<8x1xf32>
    %c0_10 = arith.constant 0 : index
    %c0_11 = arith.constant 0 : index
    %45 = vector.load %arg4[%c0_10, %c0_11] : memref<8x1xf32, #tpu.memory_space<vmem>>, vector<8x1xf32>
    %46 = arith.mulf %28, %44 : vector<8x1xf32>
    %47 = arith.subf %45, %46 : vector<8x1xf32>
    %48 = vector.broadcast %44 : vector<8x1xf32> to vector<8x512xf32>
    %49 = arith.mulf %24, %48 : vector<8x512xf32>
    %50 = vector.broadcast %47 : vector<8x1xf32> to vector<8x512xf32>
    %51 = arith.addf %49, %50 : vector<8x512xf32>
    %cst_12 = arith.constant 0.000000e+00 : f32
    %52 = vector.broadcast %cst_12 : f32 to vector<8x512xf32>
    %53 = arith.maximumf %51, %52 : vector<8x512xf32>
    %c0_13 = arith.constant 0 : index
    %c0_14 = arith.constant 0 : index
    %54 = vector.load %arg5[%c0_13, %c0_14] : memref<8x512xf32, #tpu.memory_space<vmem>>, vector<8x512xf32>
    tpu.vector_store %arg5[%c0_13, %c0_14], %53 {strides = array<i32>} : memref<8x512xf32, #tpu.memory_space<vmem>>, vector<8x512xf32>,
    %cst_15 = arith.constant 0.000000e+00 : f32
    %55 = vector.broadcast %cst_15 : f32 to vector<8x1xf32>
    %56 = arith.maximumf %47, %55 : vector<8x1xf32>
    %c0_16 = arith.constant 0 : index
    %c0_17 = arith.constant 0 : index
    %57 = vector.load %arg6[%c0_16, %c0_17] : memref<8x1xf32, #tpu.memory_space<vmem>>, vector<8x1xf32>
    tpu.vector_store %arg6[%c0_16, %c0_17], %56 {strides = array<i32>} : memref<8x1xf32, #tpu.memory_space<vmem>>, vector<8x1xf32>,
    return
  }
  func.func @transform_0(%arg0: i32) -> (i32, i32) {
    %c0_i32 = arith.constant 0 : i32
    %c0_i32_0 = arith.constant 0 : i32
    %c0_i32_1 = arith.constant 0 : i32
    return %c0_i32, %c0_i32_0 : i32, i32
  }
  func.func @transform_1(%arg0: i32) -> (i32, i32) {
    %c0_i32 = arith.constant 0 : i32
    %c0_i32_0 = arith.constant 0 : i32
    %c0_i32_1 = arith.constant 0 : i32
    return %c0_i32, %c0_i32_0 : i32, i32
  }
  func.func @transform_2(%arg0: i32) -> (i32, i32) {
    %c0_i32 = arith.constant 0 : i32
    %c0_i32_0 = arith.constant 0 : i32
    %c0_i32_1 = arith.constant 0 : i32
    return %c0_i32, %c0_i32_0 : i32, i32
  }
  func.func @transform_3(%arg0: i32) -> (i32, i32) {
    %c0_i32 = arith.constant 0 : i32
    %c0_i32_0 = arith.constant 0 : i32
    %c0_i32_1 = arith.constant 0 : i32
    return %c0_i32, %c0_i32_0 : i32, i32
  }
  func.func @transform_4(%arg0: i32) -> (i32, i32) {
    %c0_i32 = arith.constant 0 : i32
    %c0_i32_0 = arith.constant 0 : i32
    %c0_i32_1 = arith.constant 0 : i32
    return %c0_i32, %c0_i32_0 : i32, i32
  }
  func.func @transform_5(%arg0: i32) -> (i32, i32) {
    %c0_i32 = arith.constant 0 : i32
    %c0_i32_0 = arith.constant 0 : i32
    %c0_i32_1 = arith.constant 0 : i32
    return %c0_i32, %c0_i32_0 : i32, i32
  }
}

module attributes {stable_mosaic.version = 11 : i64} {
  func.func @_conv_bn_relu_kernel(%arg0: i32, %arg1: memref<36x648xf32, #tpu.memory_space<vmem>>, %arg2: memref<4x36xf32, #tpu.memory_space<vmem>>, %arg3: memref<4x1xf32, #tpu.memory_space<vmem>>, %arg4: memref<4x1xf32, #tpu.memory_space<vmem>>, %arg5: memref<4x648xf32, #tpu.memory_space<vmem>>, %arg6: memref<4x1xf32, #tpu.memory_space<vmem>>) attributes {dimension_semantics = [#tpu.dimension_semantics<arbitrary>], iteration_bounds = array<i64: 1>, scalar_prefetch = 0 : i64, scratch_operands = 0 : i64, tpu.core_type = #tpu.core_type<tc>, window_params = [{pipeline_mode = #tpu.pipeline_mode<synchronous>, transform_indices = @transform_0, window_bounds = array<i64: 36, 648>}, {pipeline_mode = #tpu.pipeline_mode<synchronous>, transform_indices = @transform_1, window_bounds = array<i64: 4, 36>}, {pipeline_mode = #tpu.pipeline_mode<synchronous>, transform_indices = @transform_2, window_bounds = array<i64: 4, 1>}, {pipeline_mode = #tpu.pipeline_mode<synchronous>, transform_indices = @transform_3, window_bounds = array<i64: 4, 1>}, {pipeline_mode = #tpu.pipeline_mode<synchronous>, transform_indices = @transform_4, window_bounds = array<i64: 4, 648>}, {pipeline_mode = #tpu.pipeline_mode<synchronous>, transform_indices = @transform_5, window_bounds = array<i64: 4, 1>}]} {
    %c0 = arith.constant 0 : index
    %c0_0 = arith.constant 0 : index
    %0 = vector.load %arg1[%c0, %c0_0] : memref<36x648xf32, #tpu.memory_space<vmem>>, vector<36x648xf32>
    %c0_1 = arith.constant 0 : index
    %c0_2 = arith.constant 0 : index
    %1 = vector.load %arg2[%c0_1, %c0_2] : memref<4x36xf32, #tpu.memory_space<vmem>>, vector<4x36xf32>
    %2 = vector.extract_strided_slice %1 {offsets = [0, 0], sizes = [4, 1], strides = [1, 1]} : vector<4x36xf32> to vector<4x1xf32>
    %3 = vector.extract_strided_slice %0 {offsets = [0, 0], sizes = [1, 648], strides = [1, 1]} : vector<36x648xf32> to vector<1x648xf32>
    %4 = vector.broadcast %2 : vector<4x1xf32> to vector<4x648xf32>
    %5 = vector.broadcast %3 : vector<1x648xf32> to vector<4x648xf32>
    %6 = arith.mulf %4, %5 : vector<4x648xf32>
    %7 = vector.extract_strided_slice %1 {offsets = [0, 1], sizes = [4, 1], strides = [1, 1]} : vector<4x36xf32> to vector<4x1xf32>
    %8 = vector.extract_strided_slice %0 {offsets = [1, 0], sizes = [1, 648], strides = [1, 1]} : vector<36x648xf32> to vector<1x648xf32>
    %9 = vector.broadcast %7 : vector<4x1xf32> to vector<4x648xf32>
    %10 = vector.broadcast %8 : vector<1x648xf32> to vector<4x648xf32>
    %11 = arith.mulf %9, %10 : vector<4x648xf32>
    %12 = arith.addf %6, %11 : vector<4x648xf32>
    %13 = vector.extract_strided_slice %1 {offsets = [0, 2], sizes = [4, 1], strides = [1, 1]} : vector<4x36xf32> to vector<4x1xf32>
    %14 = vector.extract_strided_slice %0 {offsets = [2, 0], sizes = [1, 648], strides = [1, 1]} : vector<36x648xf32> to vector<1x648xf32>
    %15 = vector.broadcast %13 : vector<4x1xf32> to vector<4x648xf32>
    %16 = vector.broadcast %14 : vector<1x648xf32> to vector<4x648xf32>
    %17 = arith.mulf %15, %16 : vector<4x648xf32>
    %18 = arith.addf %12, %17 : vector<4x648xf32>
    %19 = vector.extract_strided_slice %1 {offsets = [0, 3], sizes = [4, 1], strides = [1, 1]} : vector<4x36xf32> to vector<4x1xf32>
    %20 = vector.extract_strided_slice %0 {offsets = [3, 0], sizes = [1, 648], strides = [1, 1]} : vector<36x648xf32> to vector<1x648xf32>
    %21 = vector.broadcast %19 : vector<4x1xf32> to vector<4x648xf32>
    %22 = vector.broadcast %20 : vector<1x648xf32> to vector<4x648xf32>
    %23 = arith.mulf %21, %22 : vector<4x648xf32>
    %24 = arith.addf %18, %23 : vector<4x648xf32>
    %25 = vector.extract_strided_slice %1 {offsets = [0, 4], sizes = [4, 1], strides = [1, 1]} : vector<4x36xf32> to vector<4x1xf32>
    %26 = vector.extract_strided_slice %0 {offsets = [4, 0], sizes = [1, 648], strides = [1, 1]} : vector<36x648xf32> to vector<1x648xf32>
    %27 = vector.broadcast %25 : vector<4x1xf32> to vector<4x648xf32>
    %28 = vector.broadcast %26 : vector<1x648xf32> to vector<4x648xf32>
    %29 = arith.mulf %27, %28 : vector<4x648xf32>
    %30 = arith.addf %24, %29 : vector<4x648xf32>
    %31 = vector.extract_strided_slice %1 {offsets = [0, 5], sizes = [4, 1], strides = [1, 1]} : vector<4x36xf32> to vector<4x1xf32>
    %32 = vector.extract_strided_slice %0 {offsets = [5, 0], sizes = [1, 648], strides = [1, 1]} : vector<36x648xf32> to vector<1x648xf32>
    %33 = vector.broadcast %31 : vector<4x1xf32> to vector<4x648xf32>
    %34 = vector.broadcast %32 : vector<1x648xf32> to vector<4x648xf32>
    %35 = arith.mulf %33, %34 : vector<4x648xf32>
    %36 = arith.addf %30, %35 : vector<4x648xf32>
    %37 = vector.extract_strided_slice %1 {offsets = [0, 6], sizes = [4, 1], strides = [1, 1]} : vector<4x36xf32> to vector<4x1xf32>
    %38 = vector.extract_strided_slice %0 {offsets = [6, 0], sizes = [1, 648], strides = [1, 1]} : vector<36x648xf32> to vector<1x648xf32>
    %39 = vector.broadcast %37 : vector<4x1xf32> to vector<4x648xf32>
    %40 = vector.broadcast %38 : vector<1x648xf32> to vector<4x648xf32>
    %41 = arith.mulf %39, %40 : vector<4x648xf32>
    %42 = arith.addf %36, %41 : vector<4x648xf32>
    %43 = vector.extract_strided_slice %1 {offsets = [0, 7], sizes = [4, 1], strides = [1, 1]} : vector<4x36xf32> to vector<4x1xf32>
    %44 = vector.extract_strided_slice %0 {offsets = [7, 0], sizes = [1, 648], strides = [1, 1]} : vector<36x648xf32> to vector<1x648xf32>
    %45 = vector.broadcast %43 : vector<4x1xf32> to vector<4x648xf32>
    %46 = vector.broadcast %44 : vector<1x648xf32> to vector<4x648xf32>
    %47 = arith.mulf %45, %46 : vector<4x648xf32>
    %48 = arith.addf %42, %47 : vector<4x648xf32>
    %49 = vector.extract_strided_slice %1 {offsets = [0, 8], sizes = [4, 1], strides = [1, 1]} : vector<4x36xf32> to vector<4x1xf32>
    %50 = vector.extract_strided_slice %0 {offsets = [8, 0], sizes = [1, 648], strides = [1, 1]} : vector<36x648xf32> to vector<1x648xf32>
    %51 = vector.broadcast %49 : vector<4x1xf32> to vector<4x648xf32>
    %52 = vector.broadcast %50 : vector<1x648xf32> to vector<4x648xf32>
    %53 = arith.mulf %51, %52 : vector<4x648xf32>
    %54 = arith.addf %48, %53 : vector<4x648xf32>
    %55 = vector.extract_strided_slice %1 {offsets = [0, 9], sizes = [4, 1], strides = [1, 1]} : vector<4x36xf32> to vector<4x1xf32>
    %56 = vector.extract_strided_slice %0 {offsets = [9, 0], sizes = [1, 648], strides = [1, 1]} : vector<36x648xf32> to vector<1x648xf32>
    %57 = vector.broadcast %55 : vector<4x1xf32> to vector<4x648xf32>
    %58 = vector.broadcast %56 : vector<1x648xf32> to vector<4x648xf32>
    %59 = arith.mulf %57, %58 : vector<4x648xf32>
    %60 = arith.addf %54, %59 : vector<4x648xf32>
    %61 = vector.extract_strided_slice %1 {offsets = [0, 10], sizes = [4, 1], strides = [1, 1]} : vector<4x36xf32> to vector<4x1xf32>
    %62 = vector.extract_strided_slice %0 {offsets = [10, 0], sizes = [1, 648], strides = [1, 1]} : vector<36x648xf32> to vector<1x648xf32>
    %63 = vector.broadcast %61 : vector<4x1xf32> to vector<4x648xf32>
    %64 = vector.broadcast %62 : vector<1x648xf32> to vector<4x648xf32>
    %65 = arith.mulf %63, %64 : vector<4x648xf32>
    %66 = arith.addf %60, %65 : vector<4x648xf32>
    %67 = vector.extract_strided_slice %1 {offsets = [0, 11], sizes = [4, 1], strides = [1, 1]} : vector<4x36xf32> to vector<4x1xf32>
    %68 = vector.extract_strided_slice %0 {offsets = [11, 0], sizes = [1, 648], strides = [1, 1]} : vector<36x648xf32> to vector<1x648xf32>
    %69 = vector.broadcast %67 : vector<4x1xf32> to vector<4x648xf32>
    %70 = vector.broadcast %68 : vector<1x648xf32> to vector<4x648xf32>
    %71 = arith.mulf %69, %70 : vector<4x648xf32>
    %72 = arith.addf %66, %71 : vector<4x648xf32>
    %73 = vector.extract_strided_slice %1 {offsets = [0, 12], sizes = [4, 1], strides = [1, 1]} : vector<4x36xf32> to vector<4x1xf32>
    %74 = vector.extract_strided_slice %0 {offsets = [12, 0], sizes = [1, 648], strides = [1, 1]} : vector<36x648xf32> to vector<1x648xf32>
    %75 = vector.broadcast %73 : vector<4x1xf32> to vector<4x648xf32>
    %76 = vector.broadcast %74 : vector<1x648xf32> to vector<4x648xf32>
    %77 = arith.mulf %75, %76 : vector<4x648xf32>
    %78 = arith.addf %72, %77 : vector<4x648xf32>
    %79 = vector.extract_strided_slice %1 {offsets = [0, 13], sizes = [4, 1], strides = [1, 1]} : vector<4x36xf32> to vector<4x1xf32>
    %80 = vector.extract_strided_slice %0 {offsets = [13, 0], sizes = [1, 648], strides = [1, 1]} : vector<36x648xf32> to vector<1x648xf32>
    %81 = vector.broadcast %79 : vector<4x1xf32> to vector<4x648xf32>
    %82 = vector.broadcast %80 : vector<1x648xf32> to vector<4x648xf32>
    %83 = arith.mulf %81, %82 : vector<4x648xf32>
    %84 = arith.addf %78, %83 : vector<4x648xf32>
    %85 = vector.extract_strided_slice %1 {offsets = [0, 14], sizes = [4, 1], strides = [1, 1]} : vector<4x36xf32> to vector<4x1xf32>
    %86 = vector.extract_strided_slice %0 {offsets = [14, 0], sizes = [1, 648], strides = [1, 1]} : vector<36x648xf32> to vector<1x648xf32>
    %87 = vector.broadcast %85 : vector<4x1xf32> to vector<4x648xf32>
    %88 = vector.broadcast %86 : vector<1x648xf32> to vector<4x648xf32>
    %89 = arith.mulf %87, %88 : vector<4x648xf32>
    %90 = arith.addf %84, %89 : vector<4x648xf32>
    %91 = vector.extract_strided_slice %1 {offsets = [0, 15], sizes = [4, 1], strides = [1, 1]} : vector<4x36xf32> to vector<4x1xf32>
    %92 = vector.extract_strided_slice %0 {offsets = [15, 0], sizes = [1, 648], strides = [1, 1]} : vector<36x648xf32> to vector<1x648xf32>
    %93 = vector.broadcast %91 : vector<4x1xf32> to vector<4x648xf32>
    %94 = vector.broadcast %92 : vector<1x648xf32> to vector<4x648xf32>
    %95 = arith.mulf %93, %94 : vector<4x648xf32>
    %96 = arith.addf %90, %95 : vector<4x648xf32>
    %97 = vector.extract_strided_slice %1 {offsets = [0, 16], sizes = [4, 1], strides = [1, 1]} : vector<4x36xf32> to vector<4x1xf32>
    %98 = vector.extract_strided_slice %0 {offsets = [16, 0], sizes = [1, 648], strides = [1, 1]} : vector<36x648xf32> to vector<1x648xf32>
    %99 = vector.broadcast %97 : vector<4x1xf32> to vector<4x648xf32>
    %100 = vector.broadcast %98 : vector<1x648xf32> to vector<4x648xf32>
    %101 = arith.mulf %99, %100 : vector<4x648xf32>
    %102 = arith.addf %96, %101 : vector<4x648xf32>
    %103 = vector.extract_strided_slice %1 {offsets = [0, 17], sizes = [4, 1], strides = [1, 1]} : vector<4x36xf32> to vector<4x1xf32>
    %104 = vector.extract_strided_slice %0 {offsets = [17, 0], sizes = [1, 648], strides = [1, 1]} : vector<36x648xf32> to vector<1x648xf32>
    %105 = vector.broadcast %103 : vector<4x1xf32> to vector<4x648xf32>
    %106 = vector.broadcast %104 : vector<1x648xf32> to vector<4x648xf32>
    %107 = arith.mulf %105, %106 : vector<4x648xf32>
    %108 = arith.addf %102, %107 : vector<4x648xf32>
    %109 = vector.extract_strided_slice %1 {offsets = [0, 18], sizes = [4, 1], strides = [1, 1]} : vector<4x36xf32> to vector<4x1xf32>
    %110 = vector.extract_strided_slice %0 {offsets = [18, 0], sizes = [1, 648], strides = [1, 1]} : vector<36x648xf32> to vector<1x648xf32>
    %111 = vector.broadcast %109 : vector<4x1xf32> to vector<4x648xf32>
    %112 = vector.broadcast %110 : vector<1x648xf32> to vector<4x648xf32>
    %113 = arith.mulf %111, %112 : vector<4x648xf32>
    %114 = arith.addf %108, %113 : vector<4x648xf32>
    %115 = vector.extract_strided_slice %1 {offsets = [0, 19], sizes = [4, 1], strides = [1, 1]} : vector<4x36xf32> to vector<4x1xf32>
    %116 = vector.extract_strided_slice %0 {offsets = [19, 0], sizes = [1, 648], strides = [1, 1]} : vector<36x648xf32> to vector<1x648xf32>
    %117 = vector.broadcast %115 : vector<4x1xf32> to vector<4x648xf32>
    %118 = vector.broadcast %116 : vector<1x648xf32> to vector<4x648xf32>
    %119 = arith.mulf %117, %118 : vector<4x648xf32>
    %120 = arith.addf %114, %119 : vector<4x648xf32>
    %121 = vector.extract_strided_slice %1 {offsets = [0, 20], sizes = [4, 1], strides = [1, 1]} : vector<4x36xf32> to vector<4x1xf32>
    %122 = vector.extract_strided_slice %0 {offsets = [20, 0], sizes = [1, 648], strides = [1, 1]} : vector<36x648xf32> to vector<1x648xf32>
    %123 = vector.broadcast %121 : vector<4x1xf32> to vector<4x648xf32>
    %124 = vector.broadcast %122 : vector<1x648xf32> to vector<4x648xf32>
    %125 = arith.mulf %123, %124 : vector<4x648xf32>
    %126 = arith.addf %120, %125 : vector<4x648xf32>
    %127 = vector.extract_strided_slice %1 {offsets = [0, 21], sizes = [4, 1], strides = [1, 1]} : vector<4x36xf32> to vector<4x1xf32>
    %128 = vector.extract_strided_slice %0 {offsets = [21, 0], sizes = [1, 648], strides = [1, 1]} : vector<36x648xf32> to vector<1x648xf32>
    %129 = vector.broadcast %127 : vector<4x1xf32> to vector<4x648xf32>
    %130 = vector.broadcast %128 : vector<1x648xf32> to vector<4x648xf32>
    %131 = arith.mulf %129, %130 : vector<4x648xf32>
    %132 = arith.addf %126, %131 : vector<4x648xf32>
    %133 = vector.extract_strided_slice %1 {offsets = [0, 22], sizes = [4, 1], strides = [1, 1]} : vector<4x36xf32> to vector<4x1xf32>
    %134 = vector.extract_strided_slice %0 {offsets = [22, 0], sizes = [1, 648], strides = [1, 1]} : vector<36x648xf32> to vector<1x648xf32>
    %135 = vector.broadcast %133 : vector<4x1xf32> to vector<4x648xf32>
    %136 = vector.broadcast %134 : vector<1x648xf32> to vector<4x648xf32>
    %137 = arith.mulf %135, %136 : vector<4x648xf32>
    %138 = arith.addf %132, %137 : vector<4x648xf32>
    %139 = vector.extract_strided_slice %1 {offsets = [0, 23], sizes = [4, 1], strides = [1, 1]} : vector<4x36xf32> to vector<4x1xf32>
    %140 = vector.extract_strided_slice %0 {offsets = [23, 0], sizes = [1, 648], strides = [1, 1]} : vector<36x648xf32> to vector<1x648xf32>
    %141 = vector.broadcast %139 : vector<4x1xf32> to vector<4x648xf32>
    %142 = vector.broadcast %140 : vector<1x648xf32> to vector<4x648xf32>
    %143 = arith.mulf %141, %142 : vector<4x648xf32>
    %144 = arith.addf %138, %143 : vector<4x648xf32>
    %145 = vector.extract_strided_slice %1 {offsets = [0, 24], sizes = [4, 1], strides = [1, 1]} : vector<4x36xf32> to vector<4x1xf32>
    %146 = vector.extract_strided_slice %0 {offsets = [24, 0], sizes = [1, 648], strides = [1, 1]} : vector<36x648xf32> to vector<1x648xf32>
    %147 = vector.broadcast %145 : vector<4x1xf32> to vector<4x648xf32>
    %148 = vector.broadcast %146 : vector<1x648xf32> to vector<4x648xf32>
    %149 = arith.mulf %147, %148 : vector<4x648xf32>
    %150 = arith.addf %144, %149 : vector<4x648xf32>
    %151 = vector.extract_strided_slice %1 {offsets = [0, 25], sizes = [4, 1], strides = [1, 1]} : vector<4x36xf32> to vector<4x1xf32>
    %152 = vector.extract_strided_slice %0 {offsets = [25, 0], sizes = [1, 648], strides = [1, 1]} : vector<36x648xf32> to vector<1x648xf32>
    %153 = vector.broadcast %151 : vector<4x1xf32> to vector<4x648xf32>
    %154 = vector.broadcast %152 : vector<1x648xf32> to vector<4x648xf32>
    %155 = arith.mulf %153, %154 : vector<4x648xf32>
    %156 = arith.addf %150, %155 : vector<4x648xf32>
    %157 = vector.extract_strided_slice %1 {offsets = [0, 26], sizes = [4, 1], strides = [1, 1]} : vector<4x36xf32> to vector<4x1xf32>
    %158 = vector.extract_strided_slice %0 {offsets = [26, 0], sizes = [1, 648], strides = [1, 1]} : vector<36x648xf32> to vector<1x648xf32>
    %159 = vector.broadcast %157 : vector<4x1xf32> to vector<4x648xf32>
    %160 = vector.broadcast %158 : vector<1x648xf32> to vector<4x648xf32>
    %161 = arith.mulf %159, %160 : vector<4x648xf32>
    %162 = arith.addf %156, %161 : vector<4x648xf32>
    %163 = vector.extract_strided_slice %1 {offsets = [0, 27], sizes = [4, 1], strides = [1, 1]} : vector<4x36xf32> to vector<4x1xf32>
    %164 = vector.extract_strided_slice %0 {offsets = [27, 0], sizes = [1, 648], strides = [1, 1]} : vector<36x648xf32> to vector<1x648xf32>
    %165 = vector.broadcast %163 : vector<4x1xf32> to vector<4x648xf32>
    %166 = vector.broadcast %164 : vector<1x648xf32> to vector<4x648xf32>
    %167 = arith.mulf %165, %166 : vector<4x648xf32>
    %168 = arith.addf %162, %167 : vector<4x648xf32>
    %169 = vector.extract_strided_slice %1 {offsets = [0, 28], sizes = [4, 1], strides = [1, 1]} : vector<4x36xf32> to vector<4x1xf32>
    %170 = vector.extract_strided_slice %0 {offsets = [28, 0], sizes = [1, 648], strides = [1, 1]} : vector<36x648xf32> to vector<1x648xf32>
    %171 = vector.broadcast %169 : vector<4x1xf32> to vector<4x648xf32>
    %172 = vector.broadcast %170 : vector<1x648xf32> to vector<4x648xf32>
    %173 = arith.mulf %171, %172 : vector<4x648xf32>
    %174 = arith.addf %168, %173 : vector<4x648xf32>
    %175 = vector.extract_strided_slice %1 {offsets = [0, 29], sizes = [4, 1], strides = [1, 1]} : vector<4x36xf32> to vector<4x1xf32>
    %176 = vector.extract_strided_slice %0 {offsets = [29, 0], sizes = [1, 648], strides = [1, 1]} : vector<36x648xf32> to vector<1x648xf32>
    %177 = vector.broadcast %175 : vector<4x1xf32> to vector<4x648xf32>
    %178 = vector.broadcast %176 : vector<1x648xf32> to vector<4x648xf32>
    %179 = arith.mulf %177, %178 : vector<4x648xf32>
    %180 = arith.addf %174, %179 : vector<4x648xf32>
    %181 = vector.extract_strided_slice %1 {offsets = [0, 30], sizes = [4, 1], strides = [1, 1]} : vector<4x36xf32> to vector<4x1xf32>
    %182 = vector.extract_strided_slice %0 {offsets = [30, 0], sizes = [1, 648], strides = [1, 1]} : vector<36x648xf32> to vector<1x648xf32>
    %183 = vector.broadcast %181 : vector<4x1xf32> to vector<4x648xf32>
    %184 = vector.broadcast %182 : vector<1x648xf32> to vector<4x648xf32>
    %185 = arith.mulf %183, %184 : vector<4x648xf32>
    %186 = arith.addf %180, %185 : vector<4x648xf32>
    %187 = vector.extract_strided_slice %1 {offsets = [0, 31], sizes = [4, 1], strides = [1, 1]} : vector<4x36xf32> to vector<4x1xf32>
    %188 = vector.extract_strided_slice %0 {offsets = [31, 0], sizes = [1, 648], strides = [1, 1]} : vector<36x648xf32> to vector<1x648xf32>
    %189 = vector.broadcast %187 : vector<4x1xf32> to vector<4x648xf32>
    %190 = vector.broadcast %188 : vector<1x648xf32> to vector<4x648xf32>
    %191 = arith.mulf %189, %190 : vector<4x648xf32>
    %192 = arith.addf %186, %191 : vector<4x648xf32>
    %193 = vector.extract_strided_slice %1 {offsets = [0, 32], sizes = [4, 1], strides = [1, 1]} : vector<4x36xf32> to vector<4x1xf32>
    %194 = vector.extract_strided_slice %0 {offsets = [32, 0], sizes = [1, 648], strides = [1, 1]} : vector<36x648xf32> to vector<1x648xf32>
    %195 = vector.broadcast %193 : vector<4x1xf32> to vector<4x648xf32>
    %196 = vector.broadcast %194 : vector<1x648xf32> to vector<4x648xf32>
    %197 = arith.mulf %195, %196 : vector<4x648xf32>
    %198 = arith.addf %192, %197 : vector<4x648xf32>
    %199 = vector.extract_strided_slice %1 {offsets = [0, 33], sizes = [4, 1], strides = [1, 1]} : vector<4x36xf32> to vector<4x1xf32>
    %200 = vector.extract_strided_slice %0 {offsets = [33, 0], sizes = [1, 648], strides = [1, 1]} : vector<36x648xf32> to vector<1x648xf32>
    %201 = vector.broadcast %199 : vector<4x1xf32> to vector<4x648xf32>
    %202 = vector.broadcast %200 : vector<1x648xf32> to vector<4x648xf32>
    %203 = arith.mulf %201, %202 : vector<4x648xf32>
    %204 = arith.addf %198, %203 : vector<4x648xf32>
    %205 = vector.extract_strided_slice %1 {offsets = [0, 34], sizes = [4, 1], strides = [1, 1]} : vector<4x36xf32> to vector<4x1xf32>
    %206 = vector.extract_strided_slice %0 {offsets = [34, 0], sizes = [1, 648], strides = [1, 1]} : vector<36x648xf32> to vector<1x648xf32>
    %207 = vector.broadcast %205 : vector<4x1xf32> to vector<4x648xf32>
    %208 = vector.broadcast %206 : vector<1x648xf32> to vector<4x648xf32>
    %209 = arith.mulf %207, %208 : vector<4x648xf32>
    %210 = arith.addf %204, %209 : vector<4x648xf32>
    %211 = vector.extract_strided_slice %1 {offsets = [0, 35], sizes = [4, 1], strides = [1, 1]} : vector<4x36xf32> to vector<4x1xf32>
    %212 = vector.extract_strided_slice %0 {offsets = [35, 0], sizes = [1, 648], strides = [1, 1]} : vector<36x648xf32> to vector<1x648xf32>
    %213 = vector.broadcast %211 : vector<4x1xf32> to vector<4x648xf32>
    %214 = vector.broadcast %212 : vector<1x648xf32> to vector<4x648xf32>
    %215 = arith.mulf %213, %214 : vector<4x648xf32>
    %216 = arith.addf %210, %215 : vector<4x648xf32>
    %cst = arith.constant dense<0.000000e+00> : vector<4xf32>
    %217 = vector.multi_reduction <add>, %216, %cst [1] : vector<4x648xf32> to vector<4xf32>
    %218 = vector.shape_cast %217 : vector<4xf32> to vector<4x1xf32>
    %cst_3 = arith.constant 0.00154320989 : f32
    %219 = vector.broadcast %cst_3 : f32 to vector<4x1xf32>
    %220 = arith.mulf %218, %219 : vector<4x1xf32>
    %221 = vector.broadcast %220 : vector<4x1xf32> to vector<4x648xf32>
    %222 = arith.subf %216, %221 : vector<4x648xf32>
    %223 = arith.mulf %222, %222 : vector<4x648xf32>
    %cst_4 = arith.constant dense<0.000000e+00> : vector<4xf32>
    %224 = vector.multi_reduction <add>, %223, %cst_4 [1] : vector<4x648xf32> to vector<4xf32>
    %225 = vector.shape_cast %224 : vector<4xf32> to vector<4x1xf32>
    %cst_5 = arith.constant 0.000000e+00 : f32
    %226 = vector.broadcast %cst_5 : f32 to vector<4x1xf32>
    %227 = arith.mulf %226, %220 : vector<4x1xf32>
    %228 = arith.mulf %227, %220 : vector<4x1xf32>
    %229 = arith.addf %225, %228 : vector<4x1xf32>
    %cst_6 = arith.constant 0.00154320989 : f32
    %230 = vector.broadcast %cst_6 : f32 to vector<4x1xf32>
    %231 = arith.mulf %229, %230 : vector<4x1xf32>
    %c0_7 = arith.constant 0 : index
    %c0_8 = arith.constant 0 : index
    %232 = vector.load %arg3[%c0_7, %c0_8] : memref<4x1xf32, #tpu.memory_space<vmem>>, vector<4x1xf32>
    %cst_9 = arith.constant 9.99999974E-6 : f32
    %233 = vector.broadcast %cst_9 : f32 to vector<4x1xf32>
    %234 = arith.addf %231, %233 : vector<4x1xf32>
    %235 = math.rsqrt %234 : vector<4x1xf32>
    %236 = arith.mulf %232, %235 : vector<4x1xf32>
    %c0_10 = arith.constant 0 : index
    %c0_11 = arith.constant 0 : index
    %237 = vector.load %arg4[%c0_10, %c0_11] : memref<4x1xf32, #tpu.memory_space<vmem>>, vector<4x1xf32>
    %238 = arith.mulf %220, %236 : vector<4x1xf32>
    %239 = arith.subf %237, %238 : vector<4x1xf32>
    %240 = vector.broadcast %236 : vector<4x1xf32> to vector<4x648xf32>
    %241 = arith.mulf %216, %240 : vector<4x648xf32>
    %242 = vector.broadcast %239 : vector<4x1xf32> to vector<4x648xf32>
    %243 = arith.addf %241, %242 : vector<4x648xf32>
    %cst_12 = arith.constant 0.000000e+00 : f32
    %244 = vector.broadcast %cst_12 : f32 to vector<4x648xf32>
    %245 = arith.maximumf %243, %244 : vector<4x648xf32>
    %c0_13 = arith.constant 0 : index
    %c0_14 = arith.constant 0 : index
    %246 = vector.load %arg5[%c0_13, %c0_14] : memref<4x648xf32, #tpu.memory_space<vmem>>, vector<4x648xf32>
    tpu.vector_store %arg5[%c0_13, %c0_14], %245 {strides = array<i32>} : memref<4x648xf32, #tpu.memory_space<vmem>>, vector<4x648xf32>,
    %cst_15 = arith.constant 0.000000e+00 : f32
    %247 = vector.broadcast %cst_15 : f32 to vector<4x1xf32>
    %248 = arith.maximumf %239, %247 : vector<4x1xf32>
    %c0_16 = arith.constant 0 : index
    %c0_17 = arith.constant 0 : index
    %249 = vector.load %arg6[%c0_16, %c0_17] : memref<4x1xf32, #tpu.memory_space<vmem>>, vector<4x1xf32>
    tpu.vector_store %arg6[%c0_16, %c0_17], %248 {strides = array<i32>} : memref<4x1xf32, #tpu.memory_space<vmem>>, vector<4x1xf32>,
    return
  }
  func.func @transform_0(%arg0: i32) -> (i32, i32) {
    %c0_i32 = arith.constant 0 : i32
    %c0_i32_0 = arith.constant 0 : i32
    %c0_i32_1 = arith.constant 0 : i32
    return %c0_i32, %c0_i32_0 : i32, i32
  }
  func.func @transform_1(%arg0: i32) -> (i32, i32) {
    %c0_i32 = arith.constant 0 : i32
    %c0_i32_0 = arith.constant 0 : i32
    %c0_i32_1 = arith.constant 0 : i32
    return %c0_i32, %c0_i32_0 : i32, i32
  }
  func.func @transform_2(%arg0: i32) -> (i32, i32) {
    %c0_i32 = arith.constant 0 : i32
    %c0_i32_0 = arith.constant 0 : i32
    %c0_i32_1 = arith.constant 0 : i32
    return %c0_i32, %c0_i32_0 : i32, i32
  }
  func.func @transform_3(%arg0: i32) -> (i32, i32) {
    %c0_i32 = arith.constant 0 : i32
    %c0_i32_0 = arith.constant 0 : i32
    %c0_i32_1 = arith.constant 0 : i32
    return %c0_i32, %c0_i32_0 : i32, i32
  }
  func.func @transform_4(%arg0: i32) -> (i32, i32) {
    %c0_i32 = arith.constant 0 : i32
    %c0_i32_0 = arith.constant 0 : i32
    %c0_i32_1 = arith.constant 0 : i32
    return %c0_i32, %c0_i32_0 : i32, i32
  }
  func.func @transform_5(%arg0: i32) -> (i32, i32) {
    %c0_i32 = arith.constant 0 : i32
    %c0_i32_0 = arith.constant 0 : i32
    %c0_i32_1 = arith.constant 0 : i32
    return %c0_i32, %c0_i32_0 : i32, i32
  }
}

module attributes {stable_mosaic.version = 11 : i64} {
  func.func @_conv_bn_relu_kernel(%arg0: i32, %arg1: memref<12x648xf32, #tpu.memory_space<vmem>>, %arg2: memref<8x12xf32, #tpu.memory_space<vmem>>, %arg3: memref<8x1xf32, #tpu.memory_space<vmem>>, %arg4: memref<8x1xf32, #tpu.memory_space<vmem>>, %arg5: memref<8x648xf32, #tpu.memory_space<vmem>>, %arg6: memref<8x1xf32, #tpu.memory_space<vmem>>) attributes {dimension_semantics = [#tpu.dimension_semantics<arbitrary>], iteration_bounds = array<i64: 1>, scalar_prefetch = 0 : i64, scratch_operands = 0 : i64, tpu.core_type = #tpu.core_type<tc>, window_params = [{pipeline_mode = #tpu.pipeline_mode<synchronous>, transform_indices = @transform_0, window_bounds = array<i64: 12, 648>}, {pipeline_mode = #tpu.pipeline_mode<synchronous>, transform_indices = @transform_1, window_bounds = array<i64: 8, 12>}, {pipeline_mode = #tpu.pipeline_mode<synchronous>, transform_indices = @transform_2, window_bounds = array<i64: 8, 1>}, {pipeline_mode = #tpu.pipeline_mode<synchronous>, transform_indices = @transform_3, window_bounds = array<i64: 8, 1>}, {pipeline_mode = #tpu.pipeline_mode<synchronous>, transform_indices = @transform_4, window_bounds = array<i64: 8, 648>}, {pipeline_mode = #tpu.pipeline_mode<synchronous>, transform_indices = @transform_5, window_bounds = array<i64: 8, 1>}]} {
    %c0 = arith.constant 0 : index
    %c0_0 = arith.constant 0 : index
    %0 = vector.load %arg1[%c0, %c0_0] : memref<12x648xf32, #tpu.memory_space<vmem>>, vector<12x648xf32>
    %c0_1 = arith.constant 0 : index
    %c0_2 = arith.constant 0 : index
    %1 = vector.load %arg2[%c0_1, %c0_2] : memref<8x12xf32, #tpu.memory_space<vmem>>, vector<8x12xf32>
    %2 = vector.extract_strided_slice %1 {offsets = [0, 0], sizes = [8, 1], strides = [1, 1]} : vector<8x12xf32> to vector<8x1xf32>
    %3 = vector.extract_strided_slice %0 {offsets = [0, 0], sizes = [1, 648], strides = [1, 1]} : vector<12x648xf32> to vector<1x648xf32>
    %4 = vector.broadcast %2 : vector<8x1xf32> to vector<8x648xf32>
    %5 = vector.broadcast %3 : vector<1x648xf32> to vector<8x648xf32>
    %6 = arith.mulf %4, %5 : vector<8x648xf32>
    %7 = vector.extract_strided_slice %1 {offsets = [0, 1], sizes = [8, 1], strides = [1, 1]} : vector<8x12xf32> to vector<8x1xf32>
    %8 = vector.extract_strided_slice %0 {offsets = [1, 0], sizes = [1, 648], strides = [1, 1]} : vector<12x648xf32> to vector<1x648xf32>
    %9 = vector.broadcast %7 : vector<8x1xf32> to vector<8x648xf32>
    %10 = vector.broadcast %8 : vector<1x648xf32> to vector<8x648xf32>
    %11 = arith.mulf %9, %10 : vector<8x648xf32>
    %12 = arith.addf %6, %11 : vector<8x648xf32>
    %13 = vector.extract_strided_slice %1 {offsets = [0, 2], sizes = [8, 1], strides = [1, 1]} : vector<8x12xf32> to vector<8x1xf32>
    %14 = vector.extract_strided_slice %0 {offsets = [2, 0], sizes = [1, 648], strides = [1, 1]} : vector<12x648xf32> to vector<1x648xf32>
    %15 = vector.broadcast %13 : vector<8x1xf32> to vector<8x648xf32>
    %16 = vector.broadcast %14 : vector<1x648xf32> to vector<8x648xf32>
    %17 = arith.mulf %15, %16 : vector<8x648xf32>
    %18 = arith.addf %12, %17 : vector<8x648xf32>
    %19 = vector.extract_strided_slice %1 {offsets = [0, 3], sizes = [8, 1], strides = [1, 1]} : vector<8x12xf32> to vector<8x1xf32>
    %20 = vector.extract_strided_slice %0 {offsets = [3, 0], sizes = [1, 648], strides = [1, 1]} : vector<12x648xf32> to vector<1x648xf32>
    %21 = vector.broadcast %19 : vector<8x1xf32> to vector<8x648xf32>
    %22 = vector.broadcast %20 : vector<1x648xf32> to vector<8x648xf32>
    %23 = arith.mulf %21, %22 : vector<8x648xf32>
    %24 = arith.addf %18, %23 : vector<8x648xf32>
    %25 = vector.extract_strided_slice %1 {offsets = [0, 4], sizes = [8, 1], strides = [1, 1]} : vector<8x12xf32> to vector<8x1xf32>
    %26 = vector.extract_strided_slice %0 {offsets = [4, 0], sizes = [1, 648], strides = [1, 1]} : vector<12x648xf32> to vector<1x648xf32>
    %27 = vector.broadcast %25 : vector<8x1xf32> to vector<8x648xf32>
    %28 = vector.broadcast %26 : vector<1x648xf32> to vector<8x648xf32>
    %29 = arith.mulf %27, %28 : vector<8x648xf32>
    %30 = arith.addf %24, %29 : vector<8x648xf32>
    %31 = vector.extract_strided_slice %1 {offsets = [0, 5], sizes = [8, 1], strides = [1, 1]} : vector<8x12xf32> to vector<8x1xf32>
    %32 = vector.extract_strided_slice %0 {offsets = [5, 0], sizes = [1, 648], strides = [1, 1]} : vector<12x648xf32> to vector<1x648xf32>
    %33 = vector.broadcast %31 : vector<8x1xf32> to vector<8x648xf32>
    %34 = vector.broadcast %32 : vector<1x648xf32> to vector<8x648xf32>
    %35 = arith.mulf %33, %34 : vector<8x648xf32>
    %36 = arith.addf %30, %35 : vector<8x648xf32>
    %37 = vector.extract_strided_slice %1 {offsets = [0, 6], sizes = [8, 1], strides = [1, 1]} : vector<8x12xf32> to vector<8x1xf32>
    %38 = vector.extract_strided_slice %0 {offsets = [6, 0], sizes = [1, 648], strides = [1, 1]} : vector<12x648xf32> to vector<1x648xf32>
    %39 = vector.broadcast %37 : vector<8x1xf32> to vector<8x648xf32>
    %40 = vector.broadcast %38 : vector<1x648xf32> to vector<8x648xf32>
    %41 = arith.mulf %39, %40 : vector<8x648xf32>
    %42 = arith.addf %36, %41 : vector<8x648xf32>
    %43 = vector.extract_strided_slice %1 {offsets = [0, 7], sizes = [8, 1], strides = [1, 1]} : vector<8x12xf32> to vector<8x1xf32>
    %44 = vector.extract_strided_slice %0 {offsets = [7, 0], sizes = [1, 648], strides = [1, 1]} : vector<12x648xf32> to vector<1x648xf32>
    %45 = vector.broadcast %43 : vector<8x1xf32> to vector<8x648xf32>
    %46 = vector.broadcast %44 : vector<1x648xf32> to vector<8x648xf32>
    %47 = arith.mulf %45, %46 : vector<8x648xf32>
    %48 = arith.addf %42, %47 : vector<8x648xf32>
    %49 = vector.extract_strided_slice %1 {offsets = [0, 8], sizes = [8, 1], strides = [1, 1]} : vector<8x12xf32> to vector<8x1xf32>
    %50 = vector.extract_strided_slice %0 {offsets = [8, 0], sizes = [1, 648], strides = [1, 1]} : vector<12x648xf32> to vector<1x648xf32>
    %51 = vector.broadcast %49 : vector<8x1xf32> to vector<8x648xf32>
    %52 = vector.broadcast %50 : vector<1x648xf32> to vector<8x648xf32>
    %53 = arith.mulf %51, %52 : vector<8x648xf32>
    %54 = arith.addf %48, %53 : vector<8x648xf32>
    %55 = vector.extract_strided_slice %1 {offsets = [0, 9], sizes = [8, 1], strides = [1, 1]} : vector<8x12xf32> to vector<8x1xf32>
    %56 = vector.extract_strided_slice %0 {offsets = [9, 0], sizes = [1, 648], strides = [1, 1]} : vector<12x648xf32> to vector<1x648xf32>
    %57 = vector.broadcast %55 : vector<8x1xf32> to vector<8x648xf32>
    %58 = vector.broadcast %56 : vector<1x648xf32> to vector<8x648xf32>
    %59 = arith.mulf %57, %58 : vector<8x648xf32>
    %60 = arith.addf %54, %59 : vector<8x648xf32>
    %61 = vector.extract_strided_slice %1 {offsets = [0, 10], sizes = [8, 1], strides = [1, 1]} : vector<8x12xf32> to vector<8x1xf32>
    %62 = vector.extract_strided_slice %0 {offsets = [10, 0], sizes = [1, 648], strides = [1, 1]} : vector<12x648xf32> to vector<1x648xf32>
    %63 = vector.broadcast %61 : vector<8x1xf32> to vector<8x648xf32>
    %64 = vector.broadcast %62 : vector<1x648xf32> to vector<8x648xf32>
    %65 = arith.mulf %63, %64 : vector<8x648xf32>
    %66 = arith.addf %60, %65 : vector<8x648xf32>
    %67 = vector.extract_strided_slice %1 {offsets = [0, 11], sizes = [8, 1], strides = [1, 1]} : vector<8x12xf32> to vector<8x1xf32>
    %68 = vector.extract_strided_slice %0 {offsets = [11, 0], sizes = [1, 648], strides = [1, 1]} : vector<12x648xf32> to vector<1x648xf32>
    %69 = vector.broadcast %67 : vector<8x1xf32> to vector<8x648xf32>
    %70 = vector.broadcast %68 : vector<1x648xf32> to vector<8x648xf32>
    %71 = arith.mulf %69, %70 : vector<8x648xf32>
    %72 = arith.addf %66, %71 : vector<8x648xf32>
    %cst = arith.constant dense<0.000000e+00> : vector<8xf32>
    %73 = vector.multi_reduction <add>, %72, %cst [1] : vector<8x648xf32> to vector<8xf32>
    %74 = vector.shape_cast %73 : vector<8xf32> to vector<8x1xf32>
    %cst_3 = arith.constant 1.250000e-03 : f32
    %75 = vector.broadcast %cst_3 : f32 to vector<8x1xf32>
    %76 = arith.mulf %74, %75 : vector<8x1xf32>
    %77 = vector.broadcast %76 : vector<8x1xf32> to vector<8x648xf32>
    %78 = arith.subf %72, %77 : vector<8x648xf32>
    %79 = arith.mulf %78, %78 : vector<8x648xf32>
    %cst_4 = arith.constant dense<0.000000e+00> : vector<8xf32>
    %80 = vector.multi_reduction <add>, %79, %cst_4 [1] : vector<8x648xf32> to vector<8xf32>
    %81 = vector.shape_cast %80 : vector<8xf32> to vector<8x1xf32>
    %cst_5 = arith.constant 1.520000e+02 : f32
    %82 = vector.broadcast %cst_5 : f32 to vector<8x1xf32>
    %83 = arith.mulf %82, %76 : vector<8x1xf32>
    %84 = arith.mulf %83, %76 : vector<8x1xf32>
    %85 = arith.addf %81, %84 : vector<8x1xf32>
    %cst_6 = arith.constant 1.250000e-03 : f32
    %86 = vector.broadcast %cst_6 : f32 to vector<8x1xf32>
    %87 = arith.mulf %85, %86 : vector<8x1xf32>
    %c0_7 = arith.constant 0 : index
    %c0_8 = arith.constant 0 : index
    %88 = vector.load %arg3[%c0_7, %c0_8] : memref<8x1xf32, #tpu.memory_space<vmem>>, vector<8x1xf32>
    %cst_9 = arith.constant 9.99999974E-6 : f32
    %89 = vector.broadcast %cst_9 : f32 to vector<8x1xf32>
    %90 = arith.addf %87, %89 : vector<8x1xf32>
    %91 = math.rsqrt %90 : vector<8x1xf32>
    %92 = arith.mulf %88, %91 : vector<8x1xf32>
    %c0_10 = arith.constant 0 : index
    %c0_11 = arith.constant 0 : index
    %93 = vector.load %arg4[%c0_10, %c0_11] : memref<8x1xf32, #tpu.memory_space<vmem>>, vector<8x1xf32>
    %94 = arith.mulf %76, %92 : vector<8x1xf32>
    %95 = arith.subf %93, %94 : vector<8x1xf32>
    %96 = vector.broadcast %92 : vector<8x1xf32> to vector<8x648xf32>
    %97 = arith.mulf %72, %96 : vector<8x648xf32>
    %98 = vector.broadcast %95 : vector<8x1xf32> to vector<8x648xf32>
    %99 = arith.addf %97, %98 : vector<8x648xf32>
    %cst_12 = arith.constant 0.000000e+00 : f32
    %100 = vector.broadcast %cst_12 : f32 to vector<8x648xf32>
    %101 = arith.maximumf %99, %100 : vector<8x648xf32>
    %c0_13 = arith.constant 0 : index
    %c0_14 = arith.constant 0 : index
    %102 = vector.load %arg5[%c0_13, %c0_14] : memref<8x648xf32, #tpu.memory_space<vmem>>, vector<8x648xf32>
    tpu.vector_store %arg5[%c0_13, %c0_14], %101 {strides = array<i32>} : memref<8x648xf32, #tpu.memory_space<vmem>>, vector<8x648xf32>,
    %cst_15 = arith.constant 0.000000e+00 : f32
    %103 = vector.broadcast %cst_15 : f32 to vector<8x1xf32>
    %104 = arith.maximumf %95, %103 : vector<8x1xf32>
    %c0_16 = arith.constant 0 : index
    %c0_17 = arith.constant 0 : index
    %105 = vector.load %arg6[%c0_16, %c0_17] : memref<8x1xf32, #tpu.memory_space<vmem>>, vector<8x1xf32>
    tpu.vector_store %arg6[%c0_16, %c0_17], %104 {strides = array<i32>} : memref<8x1xf32, #tpu.memory_space<vmem>>, vector<8x1xf32>,
    return
  }
  func.func @transform_0(%arg0: i32) -> (i32, i32) {
    %c0_i32 = arith.constant 0 : i32
    %c0_i32_0 = arith.constant 0 : i32
    %c0_i32_1 = arith.constant 0 : i32
    return %c0_i32, %c0_i32_0 : i32, i32
  }
  func.func @transform_1(%arg0: i32) -> (i32, i32) {
    %c0_i32 = arith.constant 0 : i32
    %c0_i32_0 = arith.constant 0 : i32
    %c0_i32_1 = arith.constant 0 : i32
    return %c0_i32, %c0_i32_0 : i32, i32
  }
  func.func @transform_2(%arg0: i32) -> (i32, i32) {
    %c0_i32 = arith.constant 0 : i32
    %c0_i32_0 = arith.constant 0 : i32
    %c0_i32_1 = arith.constant 0 : i32
    return %c0_i32, %c0_i32_0 : i32, i32
  }
  func.func @transform_3(%arg0: i32) -> (i32, i32) {
    %c0_i32 = arith.constant 0 : i32
    %c0_i32_0 = arith.constant 0 : i32
    %c0_i32_1 = arith.constant 0 : i32
    return %c0_i32, %c0_i32_0 : i32, i32
  }
  func.func @transform_4(%arg0: i32) -> (i32, i32) {
    %c0_i32 = arith.constant 0 : i32
    %c0_i32_0 = arith.constant 0 : i32
    %c0_i32_1 = arith.constant 0 : i32
    return %c0_i32, %c0_i32_0 : i32, i32
  }
  func.func @transform_5(%arg0: i32) -> (i32, i32) {
    %c0_i32 = arith.constant 0 : i32
    %c0_i32_0 = arith.constant 0 : i32
    %c0_i32_1 = arith.constant 0 : i32
    return %c0_i32, %c0_i32_0 : i32, i32
  }
}

</mosaic_0001>

<bundles_post_ra>
// kernel: c2f_v2_forward.4
= control target key start
LH: loop header
LB: loop body
LE: loop exit
PB: predicated region body
PF: predicated region fallthrough
CT: control target
= control target key end

     0   :  { %v292_v0 = vmov 0   ;;  %v293_v2 = vmov 2   ;;  %v294_v3 = vmov 1   ;;  %v295_v4 = vmov 3   ;;  %s356_s1 = inlined_call_operand.vmem [shape: f32[8,4], index: 1, kind: input, shape index: {}]   ;;  %s357_s0 = inlined_call_operand.vmem [shape: f32[4,512], index: 0, kind: input, shape index: {}]   ;;  %s358_s2 = inlined_call_operand.vmem [shape: f32[8,1], index: 2, kind: input, shape index: {}]   ;;  %s359_s3 = inlined_call_operand.vmem [shape: f32[8,1], index: 3, kind: input, shape index: {}]   ;;  %s360_s5 = inlined_call_operand.vmem [shape: f32[8,1], index: 5, kind: output, shape index: {1}]   ;;  %s361_s4 = inlined_call_operand.vmem [shape: f32[8,512], index: 4, kind: output, shape index: {0}]  }
   0x1   :  { %284 = vset.pattern.permute.xlu0 %v292_v0  ;;  %v21_v1 = vld [vmem:[%s356_s1] sm:$0xff]  ;;  %286 = vset.pattern.permute.xlu1 %v293_v2  ;;  %v29_v5 = vlaneseq  ;;  %v20_v11 = vld [vmem:[%s357_s0 + $0x8] sm:$0xff]  ;;  %vm270_vm0 = vcmask 7168  }
   0x2   :  { %24 = vperm.xlu0 %284, %v21_v1   ;;  %118 = vperm.xlu1 %286, %v21_v1   ;;  %v19_v9 = vld [vmem:[%s357_s0] sm:$0xff] }
   0x3   :  { %v30_v6 = vshrl.u32 %v29_v5, 7 }
   0x5   :  { %v31_v7 = vsub.s32 0, %v30_v6  ;;  %v35_v8 = vsub.s32 4, %v30_v6  ;;  %v123_v10 = vsub.s32 2, %v30_v6  ;;  %v75_v12 = vsub.s32 1, %v30_v6 }
   0x6   :  { %285 = vset.pattern.permute.xlu0 %v294_v3  ;;  %287 = vset.pattern.permute.xlu1 %v295_v4  ;;  %v79_v13 = vsub.s32 5, %v30_v6  ;;  %v127_v14 = vsub.s32 6, %v30_v6  ;;  %v171_v15 = vsub.s32 3, %v30_v6  ;;  %v175_v16 = vsub.s32 7, %v30_v6 }
   0x7   :  { %70 = vperm.xlu0 %285, %v21_v1   ;;  %166 = vperm.xlu1 %287, %v21_v1   ;;  %v32_v17 = vrot.slane %v19_v9, %v31_v7  ;;  %v36_v18 = vrot.slane %v19_v9, %v35_v8  ;;  %v40_v19 = vrot.slane %v20_v11, %v31_v7 }
   0x8   :  { %v44_v20 = vrot.slane %v20_v11, %v35_v8  ;;  %v124_v21 = vrot.slane %v19_v9, %v123_v10  ;;  %v76_v22 = vrot.slane %v19_v9, %v75_v12  ;;  %v80_v23 = vrot.slane %v19_v9, %v79_v13 }
   0x9   :  { %v84_v24 = vrot.slane %v20_v11, %v75_v12  ;;  %v88_v25 = vrot.slane %v20_v11, %v79_v13  ;;  %v128_v26 = vrot.slane %v19_v9, %v127_v14  ;;  %v132_v27 = vrot.slane %v20_v11, %v123_v10 }
   0xa   :  { %v172_v28 = vrot.slane %v19_v9, %v171_v15  ;;  %v176_v29 = vrot.slane %v19_v9, %v175_v16  ;;  %v52_v31 = vrot.slane %v32_v17, %v31_v7  ;;  %v136_v33 = vrot.slane %v20_v11, %v127_v14 }
   0xb   :  { %288 = vset.pattern.permute.xlu0 %v292_v0  ;;  %289 = vset.pattern.permute.xlu1 %v292_v0  ;;  %v180_v34 = vrot.slane %v20_v11, %v171_v15  ;;  %v184_v35 = vrot.slane %v20_v11, %v175_v16  ;;  %v56_v36 = vrot.slane %v36_v18, %v31_v7 }
   0xc   :  { %v60_v37 = vrot.slane %v40_v19, %v31_v7  ;;  %v64_v38 = vrot.slane %v44_v20, %v31_v7  ;;  %v144_v39 = vrot.slane %v124_v21, %v123_v10  ;;  %v96_v40 = vrot.slane %v76_v22, %v75_v12 }
   0xd   :  { %v100_v41 = vrot.slane %v80_v23, %v75_v12  ;;  %v104_v42 = vrot.slane %v84_v24, %v75_v12  ;;  %v108_v43 = vrot.slane %v88_v25, %v75_v12  ;;  %v148_v44 = vrot.slane %v128_v26, %v123_v10 }
   0xe   :  { %v152_v45 = vrot.slane %v132_v27, %v123_v10  ;;  %v192_v46 = vrot.slane %v172_v28, %v171_v15  ;;  %v196_v47 = vrot.slane %v176_v29, %v171_v15  ;;  %v156_v49 = vrot.slane %v136_v33, %v123_v10 }
   0xf   :  { %v200_v50 = vrot.slane %v180_v34, %v171_v15  ;;  %v204_v51 = vrot.slane %v184_v35, %v171_v15 }
  0x7d   :  { %v25_v30 = vpop.permute.xlu0 %24  ;;  %v119_v32 = vpop.permute.xlu1 %118 }
  0x7e   :  { %v65_v48 = vmul.f32 %v52_v31, %v25_v30  ;;  %v66_v52 = vmul.f32 %v56_v36, %v25_v30  ;;  %v67_v53 = vmul.f32 %v60_v37, %v25_v30  ;;  %v68_v54 = vmul.f32 %v64_v38, %v25_v30 }
  0x7f   :  { %v157_v55 = vmul.f32 %v144_v39, %v119_v32  ;;  %v158_v62 = vmul.f32 %v148_v44, %v119_v32  ;;  %v159_v63 = vmul.f32 %v152_v45, %v119_v32  ;;  %v160_v6 = vmul.f32 %v156_v49, %v119_v32  ;;  %v236_v39 = vld [vmem:[%s358_s2] sm:$0xff] }
  0x82   :  { %v71_v56 = vpop.permute.xlu0 %70  ;;  %v167_v57 = vpop.permute.xlu1 %166 }
  0x83   :  { %v109_v58 = vmul.f32 %v96_v40, %v71_v56  ;;  %v110_v59 = vmul.f32 %v100_v41, %v71_v56  ;;  %v111_v60 = vmul.f32 %v104_v42, %v71_v56  ;;  %v112_v61 = vmul.f32 %v108_v43, %v71_v56  ;;  %v240_v42 = vld [vmem:[%s359_s3] sm:$0xff] }
  0x84   :  { %v205_v0 = vmul.f32 %v192_v46, %v167_v57  ;;  %v206_v1 = vmul.f32 %v196_v47, %v167_v57  ;;  %v207_v10 = vmul.f32 %v200_v50, %v167_v57  ;;  %v208_v11 = vmul.f32 %v204_v51, %v167_v57 }
  0x85   :  { %v113_v2 = vadd.f32 %v109_v58, %v65_v48  ;;  %v114_v3 = vadd.f32 %v110_v59, %v66_v52  ;;  %v115_v4 = vadd.f32 %v111_v60, %v67_v53  ;;  %v116_v5 = vadd.f32 %v112_v61, %v68_v54 }
  0x87   :  { %v161_v7 = vadd.f32 %v157_v55, %v113_v2  ;;  %v162_v8 = vadd.f32 %v158_v62, %v114_v3  ;;  %v163_v9 = vadd.f32 %v159_v63, %v115_v4  ;;  %v164_v14 = vadd.f32 %v160_v6, %v116_v5 }
  0x89   :  { %v209_v12 = vadd.f32 %v205_v0, %v161_v7  ;;  %v210_v13 = vadd.f32 %v206_v1, %v162_v8  ;;  %v211_v15 = vadd.f32 %v207_v10, %v163_v9  ;;  %v212_v17 = vadd.f32 %v208_v11, %v164_v14 }
  0x8b   :  { %v213_v16 = vadd.f32 %v210_v13, %v209_v12 }
  0x8d   :  { %v214_v18 = vadd.f32 %v213_v16, %v211_v15 }
  0x8f   :  { %v215_v19 = vadd.f32 %v214_v18, %v212_v17 }
  0x91   :  { %216 = vadd.xlane.f32.xlu1 %v215_v19 }
 0x11a   :  { %v217_v20 = vpop.xlane.xlu1 %216 }
 0x11b   :  { %v218_v21 = vmul.f32 0.0015432099, %v217_v20 }
 0x11d   :  { %v219_v22 = vsub.f32 %v209_v12, %v218_v21  ;;  %v220_v23 = vsub.f32 %v210_v13, %v218_v21  ;;  %v221_v24 = vsub.f32 %v211_v15, %v218_v21  ;;  %v222_v25 = vsub.f32 %v212_v17, %v218_v21 }
 0x11e   :  { %v232_v33 = vmul.f32 136.0, %v218_v21 }
 0x11f   :  { %v223_v26 = vmul.f32 %v219_v22, %v219_v22  ;;  %v224_v27 = vmul.f32 %v220_v23, %v220_v23  ;;  %v225_v28 = vmul.f32 %v221_v24, %v221_v24  ;;  %v226_v30 = vmul.f32 %v222_v25, %v222_v25 }
 0x120   :  { %v233_v34 = vmul.f32 %v232_v33, %v218_v21 }
 0x121   :  { %v227_v29 = vadd.f32 %v224_v27, %v223_v26 }
 0x123   :  { %v228_v31 = vadd.f32 %v227_v29, %v225_v28 }
 0x125   :  { %v229_v32 = vadd.f32 %v228_v31, %v226_v30 }
 0x127   :  { %230 = vadd.xlane.f32.xlu0 %v229_v32 }
 0x1b0   :  { %v231_v35 = vpop.xlane.xlu0 %230 }
 0x1b1   :  { %v234_v36 = vadd.f32 %v233_v34, %v231_v35 }
 0x1b3   :  { %v235_v37 = vmul.f32 0.0015432099, %v234_v36 }
 0x1b5   :  { %v237_v38 = vadd.f32 1e-05, %v235_v37 }
 0x1b7   :  { %290 = vrsqrt.f32 %v237_v38 }
 0x1c4   :  { %v291_v40 = vpop.eup %290 }
 0x1c5   :  { %v239_v41 = vmul.f32 %v291_v40, %v236_v39 }
 0x1c7   :  { %245 = vperm.xlu0 %288, %v239_v41   ;;  %v241_v43 = vmul.f32 %v239_v41, %v218_v21 }
 0x1c9   :  { %v242_v44 = vsub.f32 %v240_v42, %v241_v43 }
 0x1cb   :  { %254 = vperm.xlu1 %289, %v242_v44   ;;  %v269_v45 = vmax.f32 %v242_v44, 0.0 }
 0x1cd   :  { %271 = vst.msk [vmem:[%s360_s5] sm:$0xff] %vm270_vm0, %v269_v45 }
 0x242   :  { %v246_v46 = vpop.permute.xlu0 %245 }
 0x243   :  { %v248_v47 = vmul.f32 %v246_v46, %v209_v12  ;;  %v249_v48 = vmul.f32 %v246_v46, %v210_v13  ;;  %v250_v49 = vmul.f32 %v246_v46, %v211_v15  ;;  %v251_v50 = vmul.f32 %v246_v46, %v212_v17 }
 0x246   :  { %v255_v51 = vpop.permute.xlu1 %254 }
 0x247   :  { %v257_v52 = vadd.f32 %v255_v51, %v248_v47  ;;  %v258_v53 = vadd.f32 %v255_v51, %v249_v48  ;;  %v259_v54 = vadd.f32 %v255_v51, %v250_v49  ;;  %v260_v55 = vadd.f32 %v255_v51, %v251_v50 }
 0x249   :  { %v261_v56 = vmax.f32 %v257_v52, 0.0  ;;  %v262_v57 = vmax.f32 %v258_v53, 0.0  ;;  %v263_v58 = vmax.f32 %v259_v54, 0.0  ;;  %v264_v59 = vmax.f32 %v260_v55, 0.0 }
 0x24b   :  { %265 = vst [vmem:[%s361_s4] sm:$0xff] %v261_v56  ;;  %266 = vst [vmem:[%s361_s4 + $0x8] sm:$0xff] %v262_v57 }
 0x24c   :  { %267 = vst [vmem:[%s361_s4 + $0x10] sm:$0xff] %v263_v58  ;;  %268 = vst [vmem:[%s361_s4 + $0x18] sm:$0xff] %v264_v59 }

// kernel: c2f_v2_forward.5
= control target key start
LH: loop header
LB: loop body
LE: loop exit
PB: predicated region body
PF: predicated region fallthrough
CT: control target
= control target key end

     0   :  { %v1703_v1 = vmov 2   ;;  %v1704_v2 = vmov 0   ;;  %s3100_s0 = inlined_call_operand.vmem [shape: f32[36,648], index: 0, kind: input, shape index: {}]   ;;  %s3101_s1 = inlined_call_operand.vmem [shape: f32[4,36], index: 1, kind: input, shape index: {}]   ;;  %s3102_s2 = inlined_call_operand.vmem [shape: f32[4,1], index: 2, kind: input, shape index: {}]   ;;  %s3103_s3 = inlined_call_operand.vmem [shape: f32[4,1], index: 3, kind: input, shape index: {}]   ;;  %s3104_s4 = inlined_call_operand.vmem [shape: f32[4,648], index: 4, kind: output, shape index: {0}]   ;;  %s3105_s5 = inlined_call_operand.hbm [shape: f32[4,1], index: 5, kind: output, shape index: {1}]  }
   0x1   :  { %v1773_v0 = vld [vmem:[%s3101_s1] sm:$0xf]  ;;  %1643 = vset.pattern.permute.xlu1 %v1703_v1  ;;  %1641 = vset.pattern.permute.xlu0 %v1704_v2 }
   0x2   :  { %127 = vperm.xlu1 %1643, %v1773_v0   ;;  %53 = vperm.xlu0 %1641, %v1773_v0  }
   0x3   :  { %11 = vsyncpa [#allocation3], 0  ;;  %v1705_v3 = vmov 3   ;;  %v1706_v4 = vmov 1   ;;  %v1707_v5 = vmov 4   ;;  %v1708_v6 = vmov 5  }
   0x4   :  { %v1709_v7 = vmov 6   ;;  %v1710_v8 = vmov 8   ;;  %v1711_v9 = vmov 7   ;;  %v1712_v10 = vmov 11   ;;  %v1811_v33 = vld [vmem:[%s3100_s0] sm:$0xff]  ;;  %v1816_v34 = vld [vmem:[%s3100_s0 + $0x8] sm:$0xff] }
   0x5   :  { %v1713_v11 = vmov 9   ;;  %v1714_v12 = vmov 14   ;;  %v1715_v13 = vmov 10   ;;  %v1716_v14 = vmov 17   ;;  %v1821_v35 = vld [vmem:[%s3100_s0 + $0x10] sm:$0xff]  ;;  %v1826_v36 = vld [vmem:[%s3100_s0 + $0x18] sm:$0xff] }
   0x6   :  { %1644 = vset.pattern.permute.xlu1 %v1705_v3  ;;  %1642 = vset.pattern.permute.xlu0 %v1706_v4  ;;  %v1717_v15 = vmov 12   ;;  %v1718_v16 = vmov 20   ;;  %v1719_v17 = vmov 13   ;;  %v1720_v18 = vmov 23   ;;  %v1833_v38 = vld [vmem:[%s3100_s0 + $0x20] sm:$0xff]  ;;  %v1838_v39 = vld [vmem:[%s3100_s0 + $0x28] sm:$0xff] }
   0x7   :  { %167 = vperm.xlu1 %1644, %v1773_v0   ;;  %87 = vperm.xlu0 %1642, %v1773_v0   ;;  %v1721_v19 = vmov 15   ;;  %v1722_v20 = vmov 26   ;;  %v1723_v21 = vmov 16   ;;  %v1724_v22 = vmov 29   ;;  %s1739_s30 = smov [#allocation2]  }
   0x8   :  { %v1725_v23 = vmov 18   ;;  %v1726_v24 = vmov 32   ;;  %v1727_v25 = vmov 19   ;;  %v1728_v26 = vmov 35   ;;  %s1594_s6 = sshll.u32 %s1739_s30, 4  ;;  %s1595_s6 = int_to_ptr.vmem [resolvable:$true] %s1594_s6 }
   0x9   :  { %v1729_v27 = vmov 21   ;;  %v56_v28 = vlaneseq  ;;  %v1730_v29 = vmov 22   ;;  %v1731_v31 = vmov 24   ;;  %s1681_s7 = scalar_lea.vmem %s1595_s6, 64  ;;  %p1686_p1 = scmp.lt.s32.totalorder %s1595_s6, %s1595_s6 }
   0xa   :  { %v1732_v45 = vmov 25   ;;  %v1733_v4 = vmov 27   ;;  %vm1486_vm0 = vcmask 1043456   ;;  %vm1496_vm1 = vcmask 60416   ;;  %p1682_p0 = scmp.ne.s32.totalorder %s1595_s6, %s1681_s7  ;;  %p1687_p2 = scmp.lt.s32.totalorder %s1681_s7, %s1681_s7 }
   0xb   :  { %1645 = vset.pattern.permute.xlu1 %v1707_v5  ;;  %1646 = vset.pattern.permute.xlu0 %v1708_v6  ;;  %v57_v30 = vshrl.u32 %v56_v28, 7  ;;  %v1734_v28 = vmov 28   ;;  %vm1584_vm2 = vcmask 3072  }
   0xc   :  { %207 = vperm.xlu1 %1645, %v1773_v0   ;;  %247 = vperm.xlu0 %1646, %v1773_v0   ;;  %p1688_p3 = por %p1687_p2, %p1686_p1 }
   0xd   :  { %v1806_v32 = vsub.s32 2, %v57_v30  ;;  %v1828_v37 = vsub.s32 0, %v57_v30  ;;  %v1840_v40 = vsub.s32 3, %v57_v30  ;;  %v1842_v41 = vsub.s32 1, %v57_v30 }
   0xe   :  { %v1844_v42 = vsub.s32 4, %v57_v30  ;;  %v1846_v43 = vsub.s32 5, %v57_v30  ;;  %v1848_v44 = vsub.s32 6, %v57_v30  ;;  %p1689_p4 = pnand %p1688_p3, %p1682_p0 }
   0xf   :  { %v133_v46 = vrot.slane %v1811_v33, %v1806_v32  ;;  %v137_v47 = vrot.slane %v1816_v34, %v1806_v32  ;;  %v141_v48 = vrot.slane %v1821_v35, %v1806_v32  ;;  %v145_v49 = vrot.slane %v1826_v36, %v1806_v32 }
  0x10   :  { %1647 = vset.pattern.permute.xlu1 %v1709_v7  ;;  %1649 = vset.pattern.permute.xlu0 %v1710_v8  ;;  %v149_v50 = vrot.slane %v1833_v38, %v1806_v32  ;;  %v153_v51 = vrot.slane %v1838_v39, %v1806_v32  ;;  %v59_v52 = vrot.slane %v1811_v33, %v1828_v37 }
  0x11   :  { %287 = vperm.xlu1 %1647, %v1773_v0   ;;  %367 = vperm.xlu0 %1649, %v1773_v0   ;;  %v63_v53 = vrot.slane %v1816_v34, %v1828_v37  ;;  %v67_v54 = vrot.slane %v1821_v35, %v1828_v37  ;;  %v71_v55 = vrot.slane %v1826_v36, %v1828_v37 }
  0x12   :  { %v75_v56 = vrot.slane %v1833_v38, %v1828_v37  ;;  %v79_v57 = vrot.slane %v1838_v39, %v1828_v37  ;;  %v173_v58 = vrot.slane %v1811_v33, %v1840_v40  ;;  %v177_v59 = vrot.slane %v1816_v34, %v1840_v40 }
  0x13   :  { %v181_v60 = vrot.slane %v1821_v35, %v1840_v40  ;;  %v185_v61 = vrot.slane %v1826_v36, %v1840_v40  ;;  %v189_v62 = vrot.slane %v1833_v38, %v1840_v40  ;;  %v93_v1 = vrot.slane %v1811_v33, %v1842_v41 }
  0x14   :  { %v97_v3 = vrot.slane %v1816_v34, %v1842_v41  ;;  %v101_v5 = vrot.slane %v1821_v35, %v1842_v41  ;;  %v105_v6 = vrot.slane %v1826_v36, %v1842_v41  ;;  %v109_v7 = vrot.slane %v1833_v38, %v1842_v41 }
  0x15   :  { %1648 = vset.pattern.permute.xlu1 %v1711_v9  ;;  %1652 = vset.pattern.permute.xlu0 %v1712_v10  ;;  %v113_v8 = vrot.slane %v1838_v39, %v1842_v41 }
  0x16   :  { %327 = vperm.xlu1 %1648, %v1773_v0   ;;  %487 = vperm.xlu0 %1652, %v1773_v0  }
  0x1a   :  { %1650 = vset.pattern.permute.xlu1 %v1713_v11  ;;  %1655 = vset.pattern.permute.xlu0 %v1714_v12  ;;  %v1906_v12 = vsub.s32 7, %v57_v30  ;;  %v1968_v30 = vld [vmem:[%s3100_s0 + $0x58] sm:$0xff] }
  0x1b   :  { %407 = vperm.xlu1 %1650, %v1773_v0   ;;  %607 = vperm.xlu0 %1655, %v1773_v0  }
  0x1f   :  { %1651 = vset.pattern.permute.xlu1 %v1715_v13  ;;  %1658 = vset.pattern.permute.xlu0 %v1716_v14  ;;  %v1737_v14 = vmov 33  }
  0x20   :  { %447 = vperm.xlu1 %1651, %v1773_v0   ;;  %727 = vperm.xlu0 %1658, %v1773_v0  }
  0x24   :  { %1653 = vset.pattern.permute.xlu1 %v1717_v15  ;;  %1661 = vset.pattern.permute.xlu0 %v1718_v16  ;;  %v2192_v16 = vld [vmem:[%s3100_s0 + $0x90] sm:$0xff]  ;;  %v2197_v15 = vld [vmem:[%s3100_s0 + $0x98] sm:$0xff] }
  0x25   :  { %527 = vperm.xlu1 %1653, %v1773_v0   ;;  %847 = vperm.xlu0 %1661, %v1773_v0   ;;  %3129 = vst [vmem:[#allocation10_spill] sm:$0xff] %v2192_v16  ;;  %3130 = vst [vmem:[#allocation11_spill] sm:$0xff] %v2197_v15 }
  0x29   :  { %1654 = vset.pattern.permute.xlu1 %v1719_v17  ;;  %1664 = vset.pattern.permute.xlu0 %v1720_v18  ;;  %v2202_v18 = vld [vmem:[%s3100_s0 + $0xa0] sm:$0xff]  ;;  %v2215_v17 = vld [vmem:[%s3100_s0 + $0xa8] sm:$0xff] }
  0x2a   :  { %567 = vperm.xlu1 %1654, %v1773_v0   ;;  %967 = vperm.xlu0 %1664, %v1773_v0   ;;  %3131 = vst [vmem:[#allocation12_spill] sm:$0xff] %v2202_v18 }
  0x2e   :  { %1656 = vset.pattern.permute.xlu1 %v1721_v19  ;;  %1667 = vset.pattern.permute.xlu0 %v1722_v20  ;;  %v1735_v20 = vmov 30   ;;  %v2092_v19 = vld [vmem:[%s3100_s0 + $0x80] sm:$0xff] }
  0x2f   :  { %647 = vperm.xlu1 %1656, %v1773_v0   ;;  %1087 = vperm.xlu0 %1667, %v1773_v0   ;;  %3127 = vst [vmem:[#allocation8_spill] sm:$0xff] %v2092_v19 }
  0x33   :  { %1657 = vset.pattern.permute.xlu1 %v1723_v21  ;;  %1670 = vset.pattern.permute.xlu0 %v1724_v22  ;;  %v2064_v21 = vld [vmem:[%s3100_s0 + $0x60] sm:$0xff]  ;;  %v2097_v22 = vld [vmem:[%s3100_s0 + $0x88] sm:$0xff] }
  0x34   :  { %687 = vperm.xlu1 %1657, %v1773_v0   ;;  %1207 = vperm.xlu0 %1670, %v1773_v0   ;;  %3128 = vst [vmem:[#allocation9_spill] sm:$0xff] %v2097_v22 }
  0x38   :  { %1659 = vset.pattern.permute.xlu1 %v1725_v23  ;;  %1673 = vset.pattern.permute.xlu0 %v1726_v24  ;;  %v2087_v24 = vld [vmem:[%s3100_s0 + $0x78] sm:$0xff] }
  0x39   :  { %767 = vperm.xlu1 %1659, %v1773_v0   ;;  %1327 = vperm.xlu0 %1673, %v1773_v0   ;;  %3126 = vst [vmem:[#allocation7_spill] sm:$0xff] %v2087_v24  ;;  %v2225_v23 = vld [vmem:[%s3100_s0 + $0xb8] sm:$0xff] }
  0x3a   :  { %3132 = vst [vmem:[#allocation13_spill] sm:$0xff] %v2225_v23 }
  0x3d   :  { %1660 = vset.pattern.permute.xlu1 %v1727_v25  ;;  %1676 = vset.pattern.permute.xlu0 %v1728_v26  ;;  %v1935_v25 = vld [vmem:[%s3100_s0 + $0x30] sm:$0xff]  ;;  %v1940_v26 = vld [vmem:[%s3100_s0 + $0x38] sm:$0xff] }
  0x3e   :  { %807 = vperm.xlu1 %1660, %v1773_v0   ;;  %1447 = vperm.xlu0 %1676, %v1773_v0  }
  0x42   :  { %1662 = vset.pattern.permute.xlu1 %v1729_v27  ;;  %1678 = vset.pattern.permute.xlu0 %v1704_v2  ;;  %v1945_v27 = vld [vmem:[%s3100_s0 + $0x40] sm:$0xff] }
  0x43   :  { %887 = vperm.xlu1 %1662, %v1773_v0  }
  0x47   :  { %1663 = vset.pattern.permute.xlu1 %v1730_v29  ;;  %v1736_v29 = vmov 31  }
  0x48   :  { %927 = vperm.xlu1 %1663, %v1773_v0  }
  0x4c   :  { %1665 = vset.pattern.permute.xlu1 %v1731_v31  ;;  %v2069_v31 = vld [vmem:[%s3100_s0 + $0x68] sm:$0xff] }
  0x4d   :  { %1007 = vperm.xlu1 %1665, %v1773_v0   ;;  %3124 = vst [vmem:[#allocation5_spill] sm:$0xff] %v2069_v31 }
  0x51   :  { %1666 = vset.pattern.permute.xlu1 %v1732_v45  ;;  %v2074_v45 = vld [vmem:[%s3100_s0 + $0x70] sm:$0xff] }
  0x52   :  { %1047 = vperm.xlu1 %1666, %v1773_v0   ;;  %3125 = vst [vmem:[#allocation6_spill] sm:$0xff] %v2074_v45 }
  0x56   :  { %1668 = vset.pattern.permute.xlu1 %v1733_v4  ;;  %v1958_v4 = vld [vmem:[%s3100_s0 + $0x48] sm:$0xff] }
  0x57   :  { %1127 = vperm.xlu1 %1668, %v1773_v0  }
  0x5b   :  { %1669 = vset.pattern.permute.xlu1 %v1734_v28  ;;  %v1963_v28 = vld [vmem:[%s3100_s0 + $0x50] sm:$0xff] }
  0x5c   :  { %1167 = vperm.xlu1 %1669, %v1773_v0  }
  0x60   :  { %1671 = vset.pattern.permute.xlu1 %v1735_v20  ;;  %v2220_v20 = vld [vmem:[%s3100_s0 + $0xb0] sm:$0xff] }
  0x61   :  { %1247 = vperm.xlu1 %1671, %v1773_v0  }
  0x65   :  { %1672 = vset.pattern.permute.xlu1 %v1736_v29  ;;  %v1738_v29 = vmov 34  }
  0x66   :  { %1287 = vperm.xlu1 %1672, %v1773_v0  }
  0x6a   :  { %1674 = vset.pattern.permute.xlu1 %v1737_v14 }
  0x6b   :  { %1367 = vperm.xlu1 %1674, %v1773_v0  }
  0x6f   :  { %1675 = vset.pattern.permute.xlu1 %v1738_v29 }
  0x70   :  { %1407 = vperm.xlu1 %1675, %v1773_v0  }
  0x74   :  { %1677 = vset.pattern.permute.xlu1 %v1704_v2 }
  0x7d   :  { %v128_v9 = vpop.permute.xlu1 %127  ;;  %v54_v0 = vpop.permute.xlu0 %53 }
  0x7e   :  { %v154_v14 = vmul.f32 %v133_v46, %v128_v9  ;;  %v155_v13 = vmul.f32 %v137_v47, %v128_v9  ;;  %v156_v10 = vmul.f32 %v141_v48, %v128_v9  ;;  %v157_v29 = vmul.f32 %v145_v49, %v128_v9 }
  0x7f   :  { %v158_v46 = vmul.f32 %v149_v50, %v128_v9  ;;  %v159_v47 = vmul.f32 %v153_v51, %v128_v9  ;;  %v80_v11 = vmul.f32 %v59_v52, %v54_v0  ;;  %v81_v48 = vmul.f32 %v63_v53, %v54_v0 }
  0x80   :  { %v82_v49 = vmul.f32 %v67_v54, %v54_v0  ;;  %v83_v50 = vmul.f32 %v71_v55, %v54_v0  ;;  %v84_v51 = vmul.f32 %v75_v56, %v54_v0  ;;  %v85_v52 = vmul.f32 %v79_v57, %v54_v0 }
  0x81   :  { %v3133_v9 = vrot.slane %v1838_v39, %v1840_v40 }
  0x82   :  { %v168_v2 = vpop.permute.xlu1 %167  ;;  %v88_v63 = vpop.permute.xlu0 %87 }
  0x83   :  { %v194_v53 = vmul.f32 %v173_v58, %v168_v2  ;;  %v195_v54 = vmul.f32 %v177_v59, %v168_v2  ;;  %v196_v55 = vmul.f32 %v181_v60, %v168_v2  ;;  %v197_v56 = vmul.f32 %v185_v61, %v168_v2 }
  0x84   :  { %v114_v57 = vmul.f32 %v93_v1, %v88_v63  ;;  %v115_v58 = vmul.f32 %v97_v3, %v88_v63  ;;  %v116_v59 = vmul.f32 %v101_v5, %v88_v63  ;;  %v117_v60 = vmul.f32 %v105_v6, %v88_v63 }
  0x85   :  { %v118_v61 = vmul.f32 %v109_v7, %v88_v63  ;;  %v119_v1 = vmul.f32 %v113_v8, %v88_v63  ;;  %v198_v3 = vmul.f32 %v189_v62, %v168_v2  ;;  %v199_v5 = vmul.f32 %v3133_v9, %v168_v2 }
  0x86   :  { %v120_v0 = vadd.f32 %v114_v57, %v80_v11  ;;  %v121_v18 = vadd.f32 %v115_v58, %v81_v48  ;;  %v122_v15 = vadd.f32 %v116_v59, %v82_v49  ;;  %v123_v6 = vadd.f32 %v117_v60, %v83_v50 }
  0x87   :  { %v124_v16 = vadd.f32 %v118_v61, %v84_v51  ;;  %v125_v23 = vadd.f32 %v119_v1, %v85_v52  ;;  %v208_v22 = vpop.permute.xlu1 %207  ;;  %v3134_v63 = vrot.slane %v1811_v33, %v1844_v42  ;;  %v3135_v62 = vrot.slane %v1816_v34, %v1844_v42 }
  0x88   :  { %v160_v7 = vadd.f32 %v154_v14, %v120_v0  ;;  %v161_v19 = vadd.f32 %v155_v13, %v121_v18  ;;  %v162_v45 = vadd.f32 %v156_v10, %v122_v15  ;;  %v163_v31 = vadd.f32 %v157_v29, %v123_v6  ;;  %v248_v14 = vpop.permute.xlu0 %247 }
  0x89   :  { %v234_v8 = vmul.f32 %v3134_v63, %v208_v22  ;;  %v235_v24 = vmul.f32 %v3135_v62, %v208_v22  ;;  %v164_v2 = vadd.f32 %v158_v46, %v124_v16  ;;  %v165_v11 = vadd.f32 %v159_v47, %v125_v23 }
  0x8a   :  { %v200_v48 = vadd.f32 %v194_v53, %v160_v7  ;;  %v201_v49 = vadd.f32 %v195_v54, %v161_v19  ;;  %v3136_v50 = vrot.slane %v1821_v35, %v1844_v42  ;;  %v3137_v13 = vrot.slane %v1826_v36, %v1844_v42 }
  0x8b   :  { %v202_v52 = vadd.f32 %v196_v55, %v162_v45  ;;  %v203_v57 = vadd.f32 %v197_v56, %v163_v31  ;;  %v204_v58 = vadd.f32 %v198_v3, %v164_v2  ;;  %v205_v59 = vadd.f32 %v199_v5, %v165_v11 }
  0x8c   :  { %v236_v51 = vmul.f32 %v3136_v50, %v208_v22  ;;  %v237_v18 = vmul.f32 %v3137_v13, %v208_v22  ;;  %v3138_v10 = vrot.slane %v1833_v38, %v1844_v42  ;;  %v3139_v16 = vrot.slane %v1838_v39, %v1844_v42  ;;  %v288_v46 = vpop.permute.xlu1 %287 }
  0x8d   :  { %v240_v23 = vadd.f32 %v234_v8, %v200_v48  ;;  %v241_v29 = vadd.f32 %v235_v24, %v201_v49  ;;  %v3140_v54 = vrot.slane %v1811_v33, %v1846_v43  ;;  %v3141_v31 = vrot.slane %v1816_v34, %v1846_v43 }
  0x8e   :  { %v238_v15 = vmul.f32 %v3138_v10, %v208_v22  ;;  %v239_v19 = vmul.f32 %v3139_v16, %v208_v22  ;;  %v242_v47 = vadd.f32 %v236_v51, %v202_v52  ;;  %v243_v53 = vadd.f32 %v237_v18, %v203_v57 }
  0x8f   :  { %v274_v45 = vmul.f32 %v3140_v54, %v248_v14  ;;  %v275_v55 = vmul.f32 %v3141_v31, %v248_v14  ;;  %v3142_v61 = vrot.slane %v1821_v35, %v1846_v43  ;;  %v3143_v22 = vrot.slane %v1826_v36, %v1846_v43 }
  0x90   :  { %v244_v56 = vadd.f32 %v238_v15, %v204_v58  ;;  %v245_v60 = vadd.f32 %v239_v19, %v205_v59  ;;  %v3144_v3 = vrot.slane %v1833_v38, %v1846_v43  ;;  %v3145_v5 = vrot.slane %v1838_v39, %v1846_v43 }
  0x91   :  { %v276_v1 = vmul.f32 %v3142_v61, %v248_v14  ;;  %v277_v24 = vmul.f32 %v3143_v22, %v248_v14  ;;  %v280_v6 = vadd.f32 %v274_v45, %v240_v23  ;;  %v281_v7 = vadd.f32 %v275_v55, %v241_v29  ;;  %v328_v52 = vpop.permute.xlu1 %327  ;;  %v368_v45 = vpop.permute.xlu0 %367 }
  0x92   :  { %v278_v9 = vmul.f32 %v3144_v3, %v248_v14  ;;  %v279_v0 = vmul.f32 %v3145_v5, %v248_v14  ;;  %v3146_v62 = vrot.slane %v1811_v33, %v1848_v44  ;;  %v3147_v11 = vrot.slane %v1816_v34, %v1848_v44 }
  0x93   :  { %v282_v63 = vadd.f32 %v276_v1, %v242_v47  ;;  %v283_v8 = vadd.f32 %v277_v24, %v243_v53  ;;  %v3148_v51 = vrot.slane %v1821_v35, %v1848_v44  ;;  %v3149_v18 = vrot.slane %v1826_v36, %v1848_v44 }
  0x94   :  { %v314_v2 = vmul.f32 %v3146_v62, %v288_v46  ;;  %v315_v48 = vmul.f32 %v3147_v11, %v288_v46  ;;  %v284_v49 = vadd.f32 %v278_v9, %v244_v56  ;;  %v285_v50 = vadd.f32 %v279_v0, %v245_v60 }
  0x95   :  { %v316_v13 = vmul.f32 %v3148_v51, %v288_v46  ;;  %v317_v14 = vmul.f32 %v3149_v18, %v288_v46  ;;  %v3150_v57 = vrot.slane %v1833_v38, %v1848_v44  ;;  %v3151_v59 = vrot.slane %v1838_v39, %v1848_v44 }
  0x96   :  { %v320_v15 = vadd.f32 %v314_v2, %v280_v6  ;;  %v321_v16 = vadd.f32 %v315_v48, %v281_v7  ;;  %v3152_v29 = vrot.slane %v1811_v33, %v1906_v12  ;;  %v3153_v53 = vrot.slane %v1816_v34, %v1906_v12  ;;  %v408_v7 = vpop.permute.xlu1 %407 }
  0x97   :  { %v318_v58 = vmul.f32 %v3150_v57, %v288_v46  ;;  %v319_v10 = vmul.f32 %v3151_v59, %v288_v46  ;;  %v322_v19 = vadd.f32 %v316_v13, %v282_v63  ;;  %v323_v23 = vadd.f32 %v317_v14, %v283_v8 }
  0x98   :  { %v354_v47 = vmul.f32 %v3152_v29, %v328_v52  ;;  %v355_v54 = vmul.f32 %v3153_v53, %v328_v52  ;;  %v3154_v56 = vrot.slane %v1821_v35, %v1906_v12  ;;  %v3155_v46 = vrot.slane %v1826_v36, %v1906_v12 }
  0x99   :  { %v324_v31 = vadd.f32 %v318_v58, %v284_v49  ;;  %v325_v55 = vadd.f32 %v319_v10, %v285_v50  ;;  %v3156_v1 = vrot.slane %v1833_v38, %v1906_v12  ;;  %v3157_v22 = vrot.slane %v1838_v39, %v1906_v12 }
  0x9a   :  { %v356_v60 = vmul.f32 %v3154_v56, %v328_v52  ;;  %v357_v61 = vmul.f32 %v3155_v46, %v328_v52  ;;  %v360_v24 = vadd.f32 %v354_v47, %v320_v15  ;;  %v361_v3 = vadd.f32 %v355_v54, %v321_v16 }
  0x9b   :  { %v358_v33 = vmul.f32 %v3156_v1, %v328_v52  ;;  %v359_v34 = vmul.f32 %v3157_v22, %v328_v52  ;;  %v3158_v35 = vrot.slane %v1935_v25, %v1828_v37  ;;  %v3159_v36 = vrot.slane %v1940_v26, %v1828_v37  ;;  %v448_v56 = vpop.permute.xlu1 %447 }
  0x9c   :  { %v362_v9 = vadd.f32 %v356_v60, %v322_v19  ;;  %v363_v5 = vadd.f32 %v357_v61, %v323_v23  ;;  %v3160_v8 = vrot.slane %v1945_v27, %v1828_v37  ;;  %v3161_v62 = vrot.slane %v1958_v4, %v1828_v37 }
  0x9d   :  { %v394_v0 = vmul.f32 %v3158_v35, %v368_v45  ;;  %v395_v6 = vmul.f32 %v3159_v36, %v368_v45  ;;  %v364_v63 = vadd.f32 %v358_v33, %v324_v31  ;;  %v365_v38 = vadd.f32 %v359_v34, %v325_v55  ;;  %v488_v34 = vpop.permute.xlu0 %487 }
  0x9e   :  { %v396_v39 = vmul.f32 %v3160_v8, %v368_v45  ;;  %v397_v2 = vmul.f32 %v3161_v62, %v368_v45  ;;  %v3162_v11 = vrot.slane %v1963_v28, %v1828_v37  ;;  %v3163_v49 = vrot.slane %v1968_v30, %v1828_v37 }
  0x9f   :  { %v400_v51 = vadd.f32 %v394_v0, %v360_v24  ;;  %v401_v13 = vadd.f32 %v395_v6, %v361_v3  ;;  %v3164_v52 = vrot.slane %v1935_v25, %v1842_v41  ;;  %v3165_v58 = vrot.slane %v1940_v26, %v1842_v41 }
  0xa0   :  { %v398_v48 = vmul.f32 %v3162_v11, %v368_v45  ;;  %v399_v50 = vmul.f32 %v3163_v49, %v368_v45  ;;  %v402_v18 = vadd.f32 %v396_v39, %v362_v9  ;;  %v403_v14 = vadd.f32 %v397_v2, %v363_v5 }
  0xa1   :  { %v434_v57 = vmul.f32 %v3164_v52, %v408_v7  ;;  %v435_v59 = vmul.f32 %v3165_v58, %v408_v7  ;;  %v3166_v16 = vrot.slane %v1945_v27, %v1842_v41  ;;  %v3167_v23 = vrot.slane %v1958_v4, %v1842_v41 }
  0xa2   :  { %v404_v10 = vadd.f32 %v398_v48, %v364_v63  ;;  %v405_v15 = vadd.f32 %v399_v50, %v365_v38  ;;  %v3168_v47 = vrot.slane %v1963_v28, %v1842_v41  ;;  %v3169_v54 = vrot.slane %v1968_v30, %v1842_v41 }
  0xa3   :  { %v436_v19 = vmul.f32 %v3166_v16, %v408_v7  ;;  %v437_v29 = vmul.f32 %v3167_v23, %v408_v7  ;;  %v440_v31 = vadd.f32 %v434_v57, %v400_v51  ;;  %v441_v55 = vadd.f32 %v435_v59, %v401_v13  ;;  %v528_v57 = vpop.permute.xlu1 %527 }
  0xa4   :  { %v438_v53 = vmul.f32 %v3168_v47, %v408_v7  ;;  %v439_v45 = vmul.f32 %v3169_v54, %v408_v7  ;;  %v3170_v61 = vrot.slane %v1935_v25, %v1806_v32  ;;  %v3171_v33 = vrot.slane %v1940_v26, %v1806_v32 }
  0xa5   :  { %v442_v60 = vadd.f32 %v436_v19, %v402_v18  ;;  %v443_v46 = vadd.f32 %v437_v29, %v403_v14  ;;  %v3172_v9 = vrot.slane %v1945_v27, %v1806_v32  ;;  %v3173_v35 = vrot.slane %v1958_v4, %v1806_v32 }
  0xa6   :  { %v474_v1 = vmul.f32 %v3170_v61, %v448_v56  ;;  %v475_v22 = vmul.f32 %v3171_v33, %v448_v56  ;;  %v444_v24 = vadd.f32 %v438_v53, %v404_v10  ;;  %v445_v3 = vadd.f32 %v439_v45, %v405_v15 }
  0xa7   :  { %v476_v5 = vmul.f32 %v3172_v9, %v448_v56  ;;  %v477_v0 = vmul.f32 %v3173_v35, %v448_v56  ;;  %v3174_v36 = vrot.slane %v1963_v28, %v1806_v32  ;;  %v3175_v7 = vrot.slane %v1968_v30, %v1806_v32 }
  0xa8   :  { %v480_v38 = vadd.f32 %v474_v1, %v440_v31  ;;  %v481_v8 = vadd.f32 %v475_v22, %v441_v55  ;;  %v3176_v2 = vrot.slane %v1935_v25, %v1840_v40  ;;  %v3177_v48 = vrot.slane %v1940_v26, %v1840_v40  ;;  %v608_v31 = vpop.permute.xlu0 %607 }
  0xa9   :  { %v478_v6 = vmul.f32 %v3174_v36, %v448_v56  ;;  %v479_v63 = vmul.f32 %v3175_v7, %v448_v56  ;;  %v482_v39 = vadd.f32 %v476_v5, %v442_v60  ;;  %v483_v62 = vadd.f32 %v477_v0, %v443_v46  ;;  %v568_v0 = vpop.permute.xlu1 %567 }
  0xaa   :  { %v514_v11 = vmul.f32 %v3176_v2, %v488_v34  ;;  %v515_v49 = vmul.f32 %v3177_v48, %v488_v34  ;;  %v3178_v13 = vrot.slane %v1945_v27, %v1840_v40  ;;  %v3179_v14 = vrot.slane %v1958_v4, %v1840_v40 }
  0xab   :  { %v484_v50 = vadd.f32 %v478_v6, %v444_v24  ;;  %v485_v51 = vadd.f32 %v479_v63, %v445_v3  ;;  %v3180_v58 = vrot.slane %v1963_v28, %v1840_v40  ;;  %v3181_v10 = vrot.slane %v1968_v30, %v1840_v40 }
  0xac   :  { %v516_v18 = vmul.f32 %v3178_v13, %v488_v34  ;;  %v517_v52 = vmul.f32 %v3179_v14, %v488_v34  ;;  %v520_v16 = vadd.f32 %v514_v11, %v480_v38  ;;  %v521_v19 = vadd.f32 %v515_v49, %v481_v8 }
  0xad   :  { %v518_v59 = vmul.f32 %v3180_v58, %v488_v34  ;;  %v519_v15 = vmul.f32 %v3181_v10, %v488_v34  ;;  %v3182_v47 = vrot.slane %v1935_v25, %v1844_v42  ;;  %v3183_v54 = vrot.slane %v1940_v26, %v1844_v42 }
  0xae   :  { %v522_v23 = vadd.f32 %v516_v18, %v482_v39  ;;  %v523_v29 = vadd.f32 %v517_v52, %v483_v62  ;;  %v3184_v60 = vrot.slane %v1945_v27, %v1844_v42  ;;  %v3185_v61 = vrot.slane %v1958_v4, %v1844_v42 }
  0xaf   :  { %v554_v53 = vmul.f32 %v3182_v47, %v528_v57  ;;  %v555_v45 = vmul.f32 %v3183_v54, %v528_v57  ;;  %v524_v55 = vadd.f32 %v518_v59, %v484_v50  ;;  %v525_v56 = vadd.f32 %v519_v15, %v485_v51 }
  0xb0   :  { %v556_v46 = vmul.f32 %v3184_v60, %v528_v57  ;;  %v557_v1 = vmul.f32 %v3185_v61, %v528_v57  ;;  %v3186_v33 = vrot.slane %v1963_v28, %v1844_v42  ;;  %v3187_v34 = vrot.slane %v1968_v30, %v1844_v42 }
  0xb1   :  { %v560_v3 = vadd.f32 %v554_v53, %v520_v16  ;;  %v561_v9 = vadd.f32 %v555_v45, %v521_v19  ;;  %v3188_v36 = vrot.slane %v1935_v25, %v1848_v44  ;;  %v3189_v7 = vrot.slane %v1940_v26, %v1848_v44 }
  0xb2   :  { %v558_v22 = vmul.f32 %v3186_v33, %v528_v57  ;;  %v559_v24 = vmul.f32 %v3187_v34, %v528_v57  ;;  %v562_v5 = vadd.f32 %v556_v46, %v522_v23  ;;  %v563_v35 = vadd.f32 %v557_v1, %v523_v29  ;;  %v648_v46 = vpop.permute.xlu1 %647 }
  0xb3   :  { %v634_v6 = vmul.f32 %v3188_v36, %v608_v31  ;;  %v635_v63 = vmul.f32 %v3189_v7, %v608_v31  ;;  %v3190_v39 = vrot.slane %v1935_v25, %v1846_v43  ;;  %v3191_v2 = vrot.slane %v1940_v26, %v1846_v43  ;;  %v728_v36 = vpop.permute.xlu0 %727 }
  0xb4   :  { %v564_v38 = vadd.f32 %v558_v22, %v524_v55  ;;  %v565_v8 = vadd.f32 %v559_v24, %v525_v56  ;;  %v3192_v48 = vrot.slane %v1945_v27, %v1846_v43  ;;  %v3193_v50 = vrot.slane %v1958_v4, %v1846_v43 }
  0xb5   :  { %v594_v62 = vmul.f32 %v3190_v39, %v568_v0  ;;  %v595_v11 = vmul.f32 %v3191_v2, %v568_v0  ;;  %v3194_v13 = vrot.slane %v1963_v28, %v1846_v43  ;;  %v3195_v14 = vrot.slane %v1968_v30, %v1846_v43 }
  0xb6   :  { %v596_v49 = vmul.f32 %v3192_v48, %v568_v0  ;;  %v597_v51 = vmul.f32 %v3193_v50, %v568_v0  ;;  %v3196_v59 = vrot.slane %v1945_v27, %v1848_v44  ;;  %v3197_v15 = vrot.slane %v1958_v4, %v1848_v44 }
  0xb7   :  { %v598_v18 = vmul.f32 %v3194_v13, %v568_v0  ;;  %v599_v52 = vmul.f32 %v3195_v14, %v568_v0  ;;  %v600_v57 = vadd.f32 %v594_v62, %v560_v3  ;;  %v601_v58 = vadd.f32 %v595_v11, %v561_v9  ;;  %v688_v11 = vpop.permute.xlu1 %687 }
  0xb8   :  { %v636_v10 = vmul.f32 %v3196_v59, %v608_v31  ;;  %v637_v16 = vmul.f32 %v3197_v15, %v608_v31  ;;  %v602_v19 = vadd.f32 %v596_v49, %v562_v5  ;;  %v603_v23 = vadd.f32 %v597_v51, %v563_v35  ;;  %v3207_v49 = vld [vmem:[#allocation5_spill] sm:$0xff]  ;;  %v3213_v59 = vld [vmem:[#allocation7_spill] sm:$0xff] }
  0xb9   :  { %v604_v29 = vadd.f32 %v598_v18, %v564_v38  ;;  %v605_v47 = vadd.f32 %v599_v52, %v565_v8  ;;  %v3198_v53 = vrot.slane %v1963_v28, %v1848_v44  ;;  %v3199_v45 = vrot.slane %v1968_v30, %v1848_v44  ;;  %v3211_v52 = vld [vmem:[#allocation6_spill] sm:$0xff] }
  0xba   :  { %v640_v56 = vadd.f32 %v634_v6, %v600_v57  ;;  %v641_v60 = vadd.f32 %v635_v63, %v601_v58  ;;  %v642_v61 = vadd.f32 %v636_v10, %v602_v19  ;;  %v643_v1 = vadd.f32 %v637_v16, %v603_v23  ;;  %v3215_v16 = vld [vmem:[#allocation8_spill] sm:$0xff] }
  0xbb   :  { %v638_v54 = vmul.f32 %v3198_v53, %v608_v31  ;;  %v639_v55 = vmul.f32 %v3199_v45, %v608_v31  ;;  %v3200_v33 = vrot.slane %v1935_v25, %v1906_v12  ;;  %v3201_v34 = vrot.slane %v1940_v26, %v1906_v12 }
  0xbc   :  { %v3202_v5 = vrot.slane %v1945_v27, %v1906_v12  ;;  %v3203_v31 = vrot.slane %v1958_v4, %v1906_v12  ;;  %v3204_v6 = vrot.slane %v1963_v28, %v1906_v12  ;;  %v3205_v7 = vrot.slane %v1968_v30, %v1906_v12 }
  0xbd   :  { %v674_v22 = vmul.f32 %v3200_v33, %v648_v46  ;;  %v675_v24 = vmul.f32 %v3201_v34, %v648_v46  ;;  %v644_v3 = vadd.f32 %v638_v54, %v604_v29  ;;  %v645_v9 = vadd.f32 %v639_v55, %v605_v47  ;;  %v3217_v29 = vld [vmem:[#allocation9_spill] sm:$0xff] }
  0xbe   :  { %v676_v35 = vmul.f32 %v3202_v5, %v648_v46  ;;  %v677_v0 = vmul.f32 %v3203_v31, %v648_v46  ;;  %v678_v25 = vmul.f32 %v3204_v6, %v648_v46  ;;  %v679_v26 = vmul.f32 %v3205_v7, %v648_v46  ;;  %v2669_v31 = vld [vmem:[%s3100_s0 + $0xd0] sm:$0xf]  ;;  %v3223_v7 = vld [vmem:[#allocation13_spill] sm:$0xff] }
  0xbf   :  { %v1305_v63 = vrot.slane %v2215_v17, %v1906_v12  ;;  %v1309_v27 = vrot.slane %v2220_v20, %v1906_v12  ;;  %v680_v38 = vadd.f32 %v674_v22, %v640_v56  ;;  %v681_v8 = vadd.f32 %v675_v24, %v641_v60  ;;  %v2653_v60 = vld [vmem:[%s3100_s0 + $0xc0] sm:$0xf] }
  0xc0   :  { %v682_v39 = vadd.f32 %v676_v35, %v642_v61  ;;  %v683_v4 = vadd.f32 %v677_v0, %v643_v1  ;;  %v684_v62 = vadd.f32 %v678_v25, %v644_v3  ;;  %v685_v2 = vadd.f32 %v679_v26, %v645_v9  ;;  %v2664_v35 = vld [vmem:[%s3100_s0 + $0xc8] sm:$0xf]  ;;  %v768_v25 = vpop.permute.xlu1 %767 }
  0xc1   :  { %v3206_v28 = vrot.slane %v2064_v21, %v1842_v41  ;;  %v3208_v30 = vrot.slane %v3207_v49, %v1842_v41  ;;  %v3209_v51 = vrot.slane %v2064_v21, %v1828_v37  ;;  %v3210_v18 = vrot.slane %v3207_v49, %v1828_v37 }
  0xc2   :  { %v3212_v57 = vrot.slane %v3211_v52, %v1828_v37  ;;  %v3214_v10 = vrot.slane %v3213_v59, %v1828_v37  ;;  %v3216_v19 = vrot.slane %v3215_v16, %v1828_v37  ;;  %v3218_v47 = vrot.slane %v3217_v29, %v1828_v37 }
  0xc3   :  { %v754_v48 = vmul.f32 %v3206_v28, %v728_v36  ;;  %v755_v50 = vmul.f32 %v3208_v30, %v728_v36  ;;  %v714_v13 = vmul.f32 %v3209_v51, %v688_v11  ;;  %v715_v14 = vmul.f32 %v3210_v18, %v688_v11 }
  0xc4   :  { %v716_v58 = vmul.f32 %v3212_v57, %v688_v11  ;;  %v717_v15 = vmul.f32 %v3214_v10, %v688_v11  ;;  %v718_v23 = vmul.f32 %v3216_v19, %v688_v11  ;;  %v719_v53 = vmul.f32 %v3218_v47, %v688_v11  ;;  %v848_v11 = vpop.permute.xlu0 %847 }
  0xc5   :  { %v3219_v54 = vrot.slane %v3211_v52, %v1842_v41  ;;  %v3220_v55 = vrot.slane %v3213_v59, %v1842_v41  ;;  %v720_v46 = vadd.f32 %v714_v13, %v680_v38  ;;  %v721_v61 = vadd.f32 %v715_v14, %v681_v8 }
  0xc6   :  { %v722_v1 = vadd.f32 %v716_v58, %v682_v39  ;;  %v723_v33 = vadd.f32 %v717_v15, %v683_v4  ;;  %v724_v22 = vadd.f32 %v718_v23, %v684_v62  ;;  %v725_v34 = vadd.f32 %v719_v53, %v685_v2 }
  0xc7   :  { %v756_v45 = vmul.f32 %v3219_v54, %v728_v36  ;;  %v757_v56 = vmul.f32 %v3220_v55, %v728_v36  ;;  %v3221_v24 = vrot.slane %v3215_v16, %v1842_v41  ;;  %v3222_v9 = vrot.slane %v3217_v29, %v1842_v41 }
  0xc8   :  { %v760_v0 = vadd.f32 %v754_v48, %v720_v46  ;;  %v761_v6 = vadd.f32 %v755_v50, %v721_v61  ;;  %v1313_v26 = vrot.slane %v3223_v7, %v1906_v12  ;;  %v1333_v38 = vrot.slane %v2653_v60, %v1828_v37  ;;  %v808_v46 = vpop.permute.xlu1 %807 }
  0xc9   :  { %v758_v3 = vmul.f32 %v3221_v24, %v728_v36  ;;  %v759_v5 = vmul.f32 %v3222_v9, %v728_v36  ;;  %v762_v36 = vadd.f32 %v756_v45, %v722_v1  ;;  %v763_v8 = vadd.f32 %v757_v56, %v723_v33 }
  0xca   :  { %v3224_v39 = vrot.slane %v2064_v21, %v1806_v32  ;;  %v3225_v62 = vrot.slane %v3207_v49, %v1806_v32  ;;  %v3226_v28 = vrot.slane %v3211_v52, %v1806_v32  ;;  %v3227_v30 = vrot.slane %v3213_v59, %v1806_v32 }
  0xcb   :  { %v1337_v51 = vrot.slane %v2664_v35, %v1828_v37  ;;  %v1341_v13 = vrot.slane %v2669_v31, %v1828_v37  ;;  %v764_v18 = vadd.f32 %v758_v3, %v724_v22  ;;  %v765_v14 = vadd.f32 %v759_v5, %v725_v34 }
  0xcc   :  { %v794_v4 = vmul.f32 %v3224_v39, %v768_v25  ;;  %v795_v2 = vmul.f32 %v3225_v62, %v768_v25  ;;  %v796_v48 = vmul.f32 %v3226_v28, %v768_v25  ;;  %v797_v50 = vmul.f32 %v3227_v30, %v768_v25  ;;  %v2730_v28 = vld [vmem:[%s3100_s0 + $0xd8] sm:$0xf] }
  0xcd   :  { %v3228_v57 = vrot.slane %v3215_v16, %v1806_v32  ;;  %v3229_v10 = vrot.slane %v3217_v29, %v1806_v32  ;;  %v3230_v47 = vrot.slane %v2064_v21, %v1844_v42  ;;  %v3231_v54 = vrot.slane %v3207_v49, %v1844_v42 }
  0xce   :  { %v800_v19 = vadd.f32 %v794_v4, %v760_v0  ;;  %v801_v23 = vadd.f32 %v795_v2, %v761_v6  ;;  %v802_v55 = vadd.f32 %v796_v48, %v762_v36  ;;  %v803_v56 = vadd.f32 %v797_v50, %v763_v8  ;;  %v2735_v48 = vld [vmem:[%s3100_s0 + $0xe0] sm:$0xf] }
  0xcf   :  { %v798_v58 = vmul.f32 %v3228_v57, %v768_v25  ;;  %v799_v15 = vmul.f32 %v3229_v10, %v768_v25  ;;  %v874_v53 = vmul.f32 %v3230_v47, %v848_v11  ;;  %v875_v45 = vmul.f32 %v3231_v54, %v848_v11 }
  0xd0   :  { %v3232_v61 = vrot.slane %v3211_v52, %v1844_v42  ;;  %v3233_v33 = vrot.slane %v3213_v59, %v1844_v42  ;;  %v3234_v34 = vrot.slane %v2064_v21, %v1840_v40  ;;  %v3235_v3 = vrot.slane %v3207_v49, %v1840_v40 }
  0xd1   :  { %v3236_v5 = vrot.slane %v3211_v52, %v1840_v40  ;;  %v3237_v6 = vrot.slane %v3213_v59, %v1840_v40  ;;  %v804_v36 = vadd.f32 %v798_v58, %v764_v18  ;;  %v805_v8 = vadd.f32 %v799_v15, %v765_v14 }
  0xd2   :  { %v876_v1 = vmul.f32 %v3232_v61, %v848_v11  ;;  %v877_v22 = vmul.f32 %v3233_v33, %v848_v11  ;;  %v834_v24 = vmul.f32 %v3234_v34, %v808_v46  ;;  %v835_v9 = vmul.f32 %v3235_v3, %v808_v46 }
  0xd3   :  { %v836_v0 = vmul.f32 %v3236_v5, %v808_v46  ;;  %v837_v25 = vmul.f32 %v3237_v6, %v808_v46  ;;  %v3238_v39 = vrot.slane %v3215_v16, %v1840_v40  ;;  %v3239_v62 = vrot.slane %v3217_v29, %v1840_v40  ;;  %v968_v5 = vpop.permute.xlu0 %967 }
  0xd4   :  { %v840_v30 = vadd.f32 %v834_v24, %v800_v19  ;;  %v841_v50 = vadd.f32 %v835_v9, %v801_v23  ;;  %v3240_v10 = vrot.slane %v3215_v16, %v1844_v42  ;;  %v3241_v47 = vrot.slane %v3217_v29, %v1844_v42  ;;  %v888_v23 = vpop.permute.xlu1 %887 }
  0xd5   :  { %v838_v4 = vmul.f32 %v3238_v39, %v808_v46  ;;  %v839_v2 = vmul.f32 %v3239_v62, %v808_v46  ;;  %v842_v18 = vadd.f32 %v836_v0, %v802_v55  ;;  %v843_v14 = vadd.f32 %v837_v25, %v803_v56  ;;  %v2746_v46 = vld [vmem:[%s3100_s0 + $0xe8] sm:$0xf] }
  0xd6   :  { %v878_v15 = vmul.f32 %v3240_v10, %v848_v11  ;;  %v879_v54 = vmul.f32 %v3241_v47, %v848_v11  ;;  %v880_v61 = vadd.f32 %v874_v53, %v840_v30  ;;  %v881_v19 = vadd.f32 %v875_v45, %v841_v50 }
  0xd7   :  { %v844_v57 = vadd.f32 %v838_v4, %v804_v36  ;;  %v845_v58 = vadd.f32 %v839_v2, %v805_v8  ;;  %v1345_v55 = vrot.slane %v2730_v28, %v1828_v37  ;;  %v1349_v56 = vrot.slane %v2735_v48, %v1828_v37 }
  0xd8   :  { %v882_v33 = vadd.f32 %v876_v1, %v842_v18  ;;  %v883_v34 = vadd.f32 %v877_v22, %v843_v14  ;;  %v3242_v24 = vrot.slane %v2064_v21, %v1846_v43  ;;  %v3243_v3 = vrot.slane %v3207_v49, %v1846_v43 }
  0xd9   :  { %v3244_v53 = vrot.slane %v3211_v52, %v1846_v43  ;;  %v3245_v0 = vrot.slane %v3213_v59, %v1846_v43  ;;  %v1353_v1 = vrot.slane %v2746_v46, %v1828_v37  ;;  %v1373_v22 = vrot.slane %v2653_v60, %v1842_v41 }
  0xda   :  { %v914_v11 = vmul.f32 %v3242_v24, %v888_v23  ;;  %v915_v9 = vmul.f32 %v3243_v3, %v888_v23  ;;  %v884_v25 = vadd.f32 %v878_v15, %v844_v57  ;;  %v885_v36 = vadd.f32 %v879_v54, %v845_v58  ;;  %v928_v24 = vpop.permute.xlu1 %927 }
  0xdb   :  { %v916_v45 = vmul.f32 %v3244_v53, %v888_v23  ;;  %v917_v6 = vmul.f32 %v3245_v0, %v888_v23  ;;  %v3246_v8 = vrot.slane %v3215_v16, %v1846_v43  ;;  %v3247_v4 = vrot.slane %v3217_v29, %v1846_v43 }
  0xdc   :  { %v3248_v2 = vrot.slane %v2064_v21, %v1906_v12  ;;  %v3249_v50 = vrot.slane %v3207_v49, %v1906_v12  ;;  %v3250_v14 = vrot.slane %v3211_v52, %v1906_v12  ;;  %v3251_v58 = vrot.slane %v3213_v59, %v1906_v12 }
  0xdd   :  { %v918_v39 = vmul.f32 %v3246_v8, %v888_v23  ;;  %v919_v62 = vmul.f32 %v3247_v4, %v888_v23  ;;  %v920_v15 = vadd.f32 %v914_v11, %v880_v61  ;;  %v921_v47 = vadd.f32 %v915_v9, %v881_v19 }
  0xde   :  { %v994_v30 = vmul.f32 %v3248_v2, %v968_v5  ;;  %v995_v18 = vmul.f32 %v3249_v50, %v968_v5  ;;  %v996_v57 = vmul.f32 %v3250_v14, %v968_v5  ;;  %v997_v10 = vmul.f32 %v3251_v58, %v968_v5 }
  0xdf   :  { %v922_v54 = vadd.f32 %v916_v45, %v882_v33  ;;  %v923_v23 = vadd.f32 %v917_v6, %v883_v34  ;;  %v3252_v3 = vrot.slane %v2064_v21, %v1848_v44  ;;  %v3253_v0 = vrot.slane %v3207_v49, %v1848_v44 }
  0xe0   :  { %v3254_v4 = vrot.slane %v3211_v52, %v1848_v44  ;;  %v3255_v50 = vrot.slane %v3213_v59, %v1848_v44  ;;  %v924_v19 = vadd.f32 %v918_v39, %v884_v25  ;;  %v925_v33 = vadd.f32 %v919_v62, %v885_v36 }
  0xe1   :  { %v954_v53 = vmul.f32 %v3252_v3, %v928_v24  ;;  %v955_v8 = vmul.f32 %v3253_v0, %v928_v24  ;;  %v3256_v34 = vrot.slane %v3215_v16, %v1848_v44  ;;  %v3257_v21 = vrot.slane %v3217_v29, %v1848_v44  ;;  %v1008_v0 = vpop.permute.xlu1 %1007 }
  0xe2   :  { %v956_v2 = vmul.f32 %v3254_v4, %v928_v24  ;;  %v957_v61 = vmul.f32 %v3255_v50, %v928_v24  ;;  %v3258_v59 = vrot.slane %v3215_v16, %v1906_v12  ;;  %v3259_v25 = vrot.slane %v3217_v29, %v1906_v12 }
  0xe3   :  { %v958_v11 = vmul.f32 %v3256_v34, %v928_v24  ;;  %v959_v9 = vmul.f32 %v3257_v21, %v928_v24  ;;  %v960_v49 = vadd.f32 %v954_v53, %v920_v15  ;;  %v961_v45 = vadd.f32 %v955_v8, %v921_v47  ;;  %v3262_v8 = vld [vmem:[#allocation11_spill] sm:$0xff] }
  0xe4   :  { %v962_v6 = vadd.f32 %v956_v2, %v922_v54  ;;  %v963_v14 = vadd.f32 %v957_v61, %v923_v23  ;;  %v998_v3 = vmul.f32 %v3258_v59, %v968_v5  ;;  %v999_v36 = vmul.f32 %v3259_v25, %v968_v5  ;;  %v3260_v23 = vld [vmem:[#allocation10_spill] sm:$0xff]  ;;  %v1088_v5 = vpop.permute.xlu0 %1087 }
  0xe5   :  { %v964_v52 = vadd.f32 %v958_v11, %v924_v19  ;;  %v965_v58 = vadd.f32 %v959_v9, %v925_v33  ;;  %v1000_v39 = vadd.f32 %v994_v30, %v960_v49  ;;  %v1001_v62 = vadd.f32 %v995_v18, %v961_v45  ;;  %v3264_v30 = vld [vmem:[#allocation12_spill] sm:$0xff] }
  0xe6   :  { %v1377_v24 = vrot.slane %v2664_v35, %v1842_v41  ;;  %v1381_v15 = vrot.slane %v2669_v31, %v1842_v41  ;;  %v1002_v47 = vadd.f32 %v996_v57, %v962_v6  ;;  %v1003_v54 = vadd.f32 %v997_v10, %v963_v14 }
  0xe7   :  { %v3261_v53 = vrot.slane %v3260_v23, %v1828_v37  ;;  %v3263_v4 = vrot.slane %v3262_v8, %v1828_v37  ;;  %v3265_v18 = vrot.slane %v3264_v30, %v1828_v37  ;;  %v3266_v50 = vrot.slane %v2215_v17, %v1828_v37 }
  0xe8   :  { %v1004_v19 = vadd.f32 %v998_v3, %v964_v52  ;;  %v1005_v33 = vadd.f32 %v999_v36, %v965_v58  ;;  %v3267_v34 = vrot.slane %v2220_v20, %v1828_v37  ;;  %v3268_v21 = vrot.slane %v3223_v7, %v1828_v37 }
  0xe9   :  { %v1034_v16 = vmul.f32 %v3261_v53, %v1008_v0  ;;  %v1035_v29 = vmul.f32 %v3263_v4, %v1008_v0  ;;  %v1036_v2 = vmul.f32 %v3265_v18, %v1008_v0  ;;  %v1037_v61 = vmul.f32 %v3266_v50, %v1008_v0  ;;  %v1048_v4 = vpop.permute.xlu1 %1047 }
  0xea   :  { %v1038_v11 = vmul.f32 %v3267_v34, %v1008_v0  ;;  %v1039_v9 = vmul.f32 %v3268_v21, %v1008_v0  ;;  %v3269_v49 = vrot.slane %v3260_v23, %v1806_v32  ;;  %v3270_v6 = vrot.slane %v3262_v8, %v1806_v32 }
  0xeb   :  { %v3271_v52 = vrot.slane %v3264_v30, %v1806_v32  ;;  %v3272_v59 = vrot.slane %v2215_v17, %v1806_v32  ;;  %v1040_v25 = vadd.f32 %v1034_v16, %v1000_v39  ;;  %v1041_v36 = vadd.f32 %v1035_v29, %v1001_v62 }
  0xec   :  { %v1114_v45 = vmul.f32 %v3269_v49, %v1088_v5  ;;  %v1115_v14 = vmul.f32 %v3270_v6, %v1088_v5  ;;  %v1042_v53 = vadd.f32 %v1036_v2, %v1002_v47  ;;  %v1043_v0 = vadd.f32 %v1037_v61, %v1003_v54 }
  0xed   :  { %v1116_v58 = vmul.f32 %v3271_v52, %v1088_v5  ;;  %v1117_v3 = vmul.f32 %v3272_v59, %v1088_v5  ;;  %v3273_v18 = vrot.slane %v3260_v23, %v1842_v41  ;;  %v3274_v34 = vrot.slane %v3262_v8, %v1842_v41 }
  0xee   :  { %v3275_v49 = vrot.slane %v3264_v30, %v1842_v41  ;;  %v3276_v52 = vrot.slane %v2215_v17, %v1842_v41  ;;  %v1044_v62 = vadd.f32 %v1038_v11, %v1004_v19  ;;  %v1045_v47 = vadd.f32 %v1039_v9, %v1005_v33 }
  0xef   :  { %v1074_v50 = vmul.f32 %v3273_v18, %v1048_v4  ;;  %v1075_v21 = vmul.f32 %v3274_v34, %v1048_v4  ;;  %v3277_v54 = vrot.slane %v2220_v20, %v1842_v41  ;;  %v3278_v29 = vrot.slane %v3223_v7, %v1842_v41 }
  0xf0   :  { %v1076_v6 = vmul.f32 %v3275_v49, %v1048_v4  ;;  %v1077_v39 = vmul.f32 %v3276_v52, %v1048_v4  ;;  %v3279_v57 = vrot.slane %v2220_v20, %v1806_v32  ;;  %v3280_v19 = vrot.slane %v3223_v7, %v1806_v32 }
  0xf1   :  { %v1078_v16 = vmul.f32 %v3277_v54, %v1048_v4  ;;  %v1079_v2 = vmul.f32 %v3278_v29, %v1048_v4  ;;  %v1080_v61 = vadd.f32 %v1074_v50, %v1040_v25  ;;  %v1081_v59 = vadd.f32 %v1075_v21, %v1041_v36  ;;  %v1128_v54 = vpop.permute.xlu1 %1127 }
  0xf2   :  { %v1082_v18 = vadd.f32 %v1076_v6, %v1042_v53  ;;  %v1083_v34 = vadd.f32 %v1077_v39, %v1043_v0  ;;  %v1118_v52 = vmul.f32 %v3279_v57, %v1088_v5  ;;  %v1119_v33 = vmul.f32 %v3280_v19, %v1088_v5  ;;  %v1208_v5 = vpop.permute.xlu0 %1207 }
  0xf3   :  { %v1084_v10 = vadd.f32 %v1078_v16, %v1044_v62  ;;  %v1085_v49 = vadd.f32 %v1079_v2, %v1045_v47  ;;  %v1120_v11 = vadd.f32 %v1114_v45, %v1080_v61  ;;  %v1121_v9 = vadd.f32 %v1115_v14, %v1081_v59 }
  0xf4   :  { %v1122_v36 = vadd.f32 %v1116_v58, %v1082_v18  ;;  %v1123_v53 = vadd.f32 %v1117_v3, %v1083_v34  ;;  %v3281_v0 = vrot.slane %v3260_v23, %v1840_v40  ;;  %v3282_v57 = vrot.slane %v3262_v8, %v1840_v40 }
  0xf5   :  { %v3283_v45 = vrot.slane %v3264_v30, %v1840_v40  ;;  %v3284_v6 = vrot.slane %v2215_v17, %v1840_v40  ;;  %v1124_v62 = vadd.f32 %v1118_v52, %v1084_v10  ;;  %v1125_v47 = vadd.f32 %v1119_v33, %v1085_v49 }
  0xf6   :  { %v1154_v50 = vmul.f32 %v3281_v0, %v1128_v54  ;;  %v1155_v21 = vmul.f32 %v3282_v57, %v1128_v54  ;;  %v3285_v16 = vrot.slane %v2220_v20, %v1840_v40  ;;  %v3286_v2 = vrot.slane %v3223_v7, %v1840_v40 }
  0xf7   :  { %v1156_v14 = vmul.f32 %v3283_v45, %v1128_v54  ;;  %v1157_v39 = vmul.f32 %v3284_v6, %v1128_v54  ;;  %v3287_v59 = vrot.slane %v3260_v23, %v1846_v43  ;;  %v3288_v34 = vrot.slane %v3262_v8, %v1846_v43  ;;  %v1168_v6 = vpop.permute.xlu1 %1167 }
  0xf8   :  { %v1158_v29 = vmul.f32 %v3285_v16, %v1128_v54  ;;  %v1159_v61 = vmul.f32 %v3286_v2, %v1128_v54  ;;  %v3289_v10 = vrot.slane %v3264_v30, %v1846_v43  ;;  %v3290_v52 = vrot.slane %v2215_v17, %v1846_v43 }
  0xf9   :  { %v1234_v18 = vmul.f32 %v3287_v59, %v1208_v5  ;;  %v1235_v19 = vmul.f32 %v3288_v34, %v1208_v5  ;;  %v1160_v0 = vadd.f32 %v1154_v50, %v1120_v11  ;;  %v1161_v57 = vadd.f32 %v1155_v21, %v1121_v9 }
  0xfa   :  { %v1236_v49 = vmul.f32 %v3289_v10, %v1208_v5  ;;  %v1237_v33 = vmul.f32 %v3290_v52, %v1208_v5  ;;  %v1162_v45 = vadd.f32 %v1156_v14, %v1122_v36  ;;  %v1163_v54 = vadd.f32 %v1157_v39, %v1123_v53 }
  0xfb   :  { %v3291_v16 = vrot.slane %v3260_v23, %v1844_v42  ;;  %v3292_v59 = vrot.slane %v3262_v8, %v1844_v42  ;;  %v3293_v10 = vrot.slane %v3264_v30, %v1844_v42  ;;  %v3294_v52 = vrot.slane %v2215_v17, %v1844_v42 }
  0xfc   :  { %v1164_v9 = vadd.f32 %v1158_v29, %v1124_v62  ;;  %v1165_v36 = vadd.f32 %v1159_v61, %v1125_v47  ;;  %v3295_v53 = vrot.slane %v2220_v20, %v1844_v42  ;;  %v3296_v21 = vrot.slane %v3223_v7, %v1844_v42 }
  0xfd   :  { %v1194_v2 = vmul.f32 %v3291_v16, %v1168_v6  ;;  %v1195_v34 = vmul.f32 %v3292_v59, %v1168_v6  ;;  %v1196_v3 = vmul.f32 %v3293_v10, %v1168_v6  ;;  %v1197_v11 = vmul.f32 %v3294_v52, %v1168_v6 }
  0xfe   :  { %v1198_v50 = vmul.f32 %v3295_v53, %v1168_v6  ;;  %v1199_v14 = vmul.f32 %v3296_v21, %v1168_v6  ;;  %v3297_v4 = vrot.slane %v2220_v20, %v1846_v43  ;;  %v3298_v62 = vrot.slane %v3223_v7, %v1846_v43  ;;  %v1248_v53 = vpop.permute.xlu1 %1247 }
  0xff   :  { %v1200_v39 = vadd.f32 %v1194_v2, %v1160_v0  ;;  %v1201_v16 = vadd.f32 %v1195_v34, %v1161_v57  ;;  %v1202_v59 = vadd.f32 %v1196_v3, %v1162_v45  ;;  %v1203_v58 = vadd.f32 %v1197_v11, %v1163_v54 }
 0x100   :  { %v1204_v25 = vadd.f32 %v1198_v50, %v1164_v9  ;;  %v1205_v10 = vadd.f32 %v1199_v14, %v1165_v36  ;;  %v1238_v52 = vmul.f32 %v3297_v4, %v1208_v5  ;;  %v1239_v47 = vmul.f32 %v3298_v62, %v1208_v5  ;;  %v1328_v5 = vpop.permute.xlu0 %1327 }
 0x101   :  { %v1240_v29 = vadd.f32 %v1234_v18, %v1200_v39  ;;  %v1241_v61 = vadd.f32 %v1235_v19, %v1201_v16  ;;  %v1425_v42 = vrot.slane %v2730_v28, %v1806_v32  ;;  %v1429_v3 = vrot.slane %v2735_v48, %v1806_v32 }
 0x102   :  { %v1242_v0 = vadd.f32 %v1236_v49, %v1202_v59  ;;  %v1243_v57 = vadd.f32 %v1237_v33, %v1203_v58  ;;  %v3299_v45 = vrot.slane %v3260_v23, %v1848_v44  ;;  %v3300_v4 = vrot.slane %v3262_v8, %v1848_v44 }
 0x103   :  { %v3301_v18 = vrot.slane %v3264_v30, %v1848_v44  ;;  %v3302_v6 = vrot.slane %v2215_v17, %v1848_v44  ;;  %v1453_v58 = vrot.slane %v2653_v60, %v1840_v40  ;;  %v1457_v49 = vrot.slane %v2664_v35, %v1840_v40 }
 0x104   :  { %v1274_v54 = vmul.f32 %v3299_v45, %v1248_v53  ;;  %v1275_v43 = vmul.f32 %v3300_v4, %v1248_v53  ;;  %v1244_v33 = vadd.f32 %v1238_v52, %v1204_v25  ;;  %v1245_v34 = vadd.f32 %v1239_v47, %v1205_v10  ;;  %v1288_v52 = vpop.permute.xlu1 %1287 }
 0x105   :  { %v1276_v19 = vmul.f32 %v3301_v18, %v1248_v53  ;;  %v1277_v2 = vmul.f32 %v3302_v6, %v1248_v53  ;;  %v3303_v11 = vrot.slane %v2220_v20, %v1848_v44  ;;  %v3304_v36 = vrot.slane %v3223_v7, %v1848_v44 }
 0x106   :  { %v1354_v21 = vmul.f32 %v1333_v38, %v1328_v5  ;;  %v1355_v14 = vmul.f32 %v1337_v51, %v1328_v5  ;;  %v1356_v25 = vmul.f32 %v1341_v13, %v1328_v5  ;;  %v1357_v39 = vmul.f32 %v1345_v55, %v1328_v5 }
 0x107   :  { %v1278_v9 = vmul.f32 %v3303_v11, %v1248_v53  ;;  %v1279_v50 = vmul.f32 %v3304_v36, %v1248_v53  ;;  %v1280_v16 = vadd.f32 %v1274_v54, %v1240_v29  ;;  %v1281_v59 = vadd.f32 %v1275_v43, %v1241_v61  ;;  %v1448_v43 = vpop.permute.xlu0 %1447 }
 0x108   :  { %v1282_v44 = vadd.f32 %v1276_v19, %v1242_v0  ;;  %v1283_v10 = vadd.f32 %v1277_v2, %v1243_v57  ;;  %v3305_v38 = vrot.slane %v3260_v23, %v1906_v12  ;;  %v3306_v51 = vrot.slane %v3262_v8, %v1906_v12 }
 0x109   :  { %v3307_v13 = vrot.slane %v3264_v30, %v1906_v12  ;;  %v1317_v55 = vmul.f32 %v1305_v63, %v1288_v52  ;;  %v1284_v29 = vadd.f32 %v1278_v9, %v1244_v33  ;;  %v1285_v61 = vadd.f32 %v1279_v50, %v1245_v34 }
 0x10a   :  { %v1314_v62 = vmul.f32 %v3305_v38, %v1288_v52  ;;  %v1315_v47 = vmul.f32 %v3306_v51, %v1288_v52  ;;  %v1318_v0 = vmul.f32 %v1309_v27, %v1288_v52  ;;  %v1319_v23 = vmul.f32 %v1313_v26, %v1288_v52  ;;  %v1368_v26 = vpop.permute.xlu1 %1367 }
 0x10b   :  { %v1316_v53 = vmul.f32 %v3307_v13, %v1288_v52  ;;  %v1323_v54 = vadd.f32 %v1317_v55, %v1283_v10  ;;  %v1358_v17 = vmul.f32 %v1349_v56, %v1328_v5  ;;  %v1359_v63 = vmul.f32 %v1353_v1, %v1328_v5 }
 0x10c   :  { %v1320_v8 = vadd.f32 %v1314_v62, %v1280_v16  ;;  %v1321_v57 = vadd.f32 %v1315_v47, %v1281_v59  ;;  %v1324_v30 = vadd.f32 %v1318_v0, %v1284_v29  ;;  %v1461_v20 = vrot.slane %v2669_v31, %v1840_v40 }
 0x10d   :  { %v1322_v45 = vadd.f32 %v1316_v53, %v1282_v44  ;;  %v1325_v27 = vadd.f32 %v1319_v23, %v1285_v61  ;;  %v1363_v18 = vadd.f32 %v1357_v39, %v1323_v54  ;;  %v1394_v19 = vmul.f32 %v1373_v22, %v1368_v26 }
 0x10e   :  { %v1360_v4 = vadd.f32 %v1354_v21, %v1320_v8  ;;  %v1361_v12 = vadd.f32 %v1355_v14, %v1321_v57  ;;  %v1395_v56 = vmul.f32 %v1377_v24, %v1368_v26  ;;  %v1396_v37 = vmul.f32 %v1381_v15, %v1368_v26  ;;  %v1408_v44 = vpop.permute.xlu1 %1407 }
 0x10f   :  { %v1362_v7 = vadd.f32 %v1356_v25, %v1322_v45  ;;  %v3308_v1 = vrot.slane %v2730_v28, %v1842_v41  ;;  %v1465_v6 = vrot.slane %v2730_v28, %v1840_v40  ;;  %v1433_v2 = vrot.slane %v2746_v46, %v1806_v32 }
 0x110   :  { %v1469_v22 = vrot.slane %v2735_v48, %v1840_v40  ;;  %v1364_v33 = vadd.f32 %v1358_v17, %v1324_v30  ;;  %v3309_v24 = vrot.slane %v2735_v48, %v1842_v41  ;;  %v1474_v11 = vmul.f32 %v1453_v58, %v1448_v43 }
 0x111   :  { %v1397_v5 = vmul.f32 %v3308_v1, %v1368_v26  ;;  %v1473_v15 = vrot.slane %v2746_v46, %v1840_v40  ;;  %v3310_v9 = vrot.slane %v2746_v46, %v1842_v41  ;;  %v1475_v50 = vmul.f32 %v1457_v49, %v1448_v43 }
 0x112   :  { %v1398_v34 = vmul.f32 %v3309_v24, %v1368_v26  ;;  %v1476_v21 = vmul.f32 %v1461_v20, %v1448_v43  ;;  %v1365_v14 = vadd.f32 %v1359_v63, %v1325_v27  ;;  %v1400_v25 = vadd.f32 %v1394_v19, %v1360_v4 }
 0x113   :  { %v1399_v36 = vmul.f32 %v3310_v9, %v1368_v26  ;;  %v1401_v39 = vadd.f32 %v1395_v56, %v1361_v12  ;;  %v1402_v16 = vadd.f32 %v1396_v37, %v1362_v7  ;;  %v1403_v59 = vadd.f32 %v1397_v5, %v1363_v18 }
 0x114   :  { %v3311_v10 = vrot.slane %v2653_v60, %v1806_v32  ;;  %v3312_v58 = vrot.slane %v2664_v35, %v1806_v32  ;;  %v3313_v41 = vrot.slane %v2669_v31, %v1806_v32  ;;  %v1437_v49 = vmul.f32 %v1425_v42, %v1408_v44 }
 0x115   :  { %v1438_v38 = vmul.f32 %v1429_v3, %v1408_v44  ;;  %v1477_v62 = vmul.f32 %v1465_v6, %v1448_v43  ;;  %v1404_v51 = vadd.f32 %v1398_v34, %v1364_v33  ;;  %v1439_v60 = vmul.f32 %v1433_v2, %v1408_v44 }
 0x116   :  { %v1434_v52 = vmul.f32 %v3311_v10, %v1408_v44  ;;  %v1435_v40 = vmul.f32 %v3312_v58, %v1408_v44  ;;  %v1436_v46 = vmul.f32 %v3313_v41, %v1408_v44  ;;  %v1443_v35 = vadd.f32 %v1437_v49, %v1403_v59  ;;  %v1531_v41 = vld [vmem:[%s3102_s2] sm:$0xf] }
 0x117   :  { %v1405_v55 = vadd.f32 %v1399_v36, %v1365_v14  ;;  %v1478_v29 = vmul.f32 %v1469_v22, %v1448_v43  ;;  %v1444_v28 = vadd.f32 %v1438_v38, %v1404_v51  ;;  %v1479_v0 = vmul.f32 %v1473_v15, %v1448_v43  ;;  %v1535_v38 = vld [vmem:[%s3103_s3] sm:$0xf] }
 0x118   :  { %v1440_v47 = vadd.f32 %v1434_v52, %v1400_v25  ;;  %v1441_v13 = vadd.f32 %v1435_v40, %v1401_v39  ;;  %v1442_v53 = vadd.f32 %v1436_v46, %v1402_v16  ;;  %v3045_v48 = vadd.f32 %v1477_v62, %v1443_v35 }
 0x119   :  { %v1445_v32 = vadd.f32 %v1439_v60, %v1405_v55  ;;  %v3051_v57 = vadd.f32 %v1478_v29, %v1444_v28 }
 0x11a   :  { %v3039_v31 = vadd.f32 %v1474_v11, %v1440_v47  ;;  %v3041_v61 = vadd.f32 %v1475_v50, %v1441_v13  ;;  %v3043_v42 = vadd.f32 %v1476_v21, %v1442_v53  ;;  %v1492_v17 = vsel %vm1486_vm0, %v3045_v48, 0.0 }
 0x11b   :  { %v3055_v30 = vadd.f32 %v1479_v0, %v1445_v32  ;;  %v1494_v20 = vsel %vm1486_vm0, %v3051_v57, 0.0 }
 0x11c   :  { %v1487_v3 = vsel %vm1486_vm0, %v3039_v31, 0.0  ;;  %v1488_v23 = vsel %vm1486_vm0, %v3041_v61, 0.0  ;;  %v1490_v45 = vsel %vm1486_vm0, %v3043_v42, 0.0 }
 0x11d   :  { %v1489_v8 = vadd.f32 %v1488_v23, %v1487_v3  ;;  %v1497_v4 = vsel %vm1496_vm1, %v3055_v30, 0.0 }
 0x11f   :  { %v1491_v54 = vadd.f32 %v1490_v45, %v1489_v8 }
 0x121   :  { %v1493_v63 = vadd.f32 %v1492_v17, %v1491_v54 }
 0x123   :  { %v1495_v27 = vadd.f32 %v1494_v20, %v1493_v63 }
 0x125   :  { %v1498_v12 = vadd.f32 %v1497_v4, %v1495_v27 }
 0x127   :  { %1499 = vadd.xlane.f32.xlu1 %v1498_v12 }
 0x1b0   :  { %v1500_v7 = vpop.xlane.xlu1 %1499 }
 0x1b1   :  { %v1501_v26 = vmul.f32 0.0015432099, %v1500_v7 }
 0x1b3   :  { %v1502_v43 = vsub.f32 %v3039_v31, %v1501_v26  ;;  %v1503_v18 = vsub.f32 %v3041_v61, %v1501_v26  ;;  %v1504_v19 = vsub.f32 %v3043_v42, %v1501_v26  ;;  %v1505_v56 = vsub.f32 %v3045_v48, %v1501_v26 }
 0x1b4   :  { %v1506_v37 = vsub.f32 %v3051_v57, %v1501_v26  ;;  %v1507_v2 = vsub.f32 %v3055_v30, %v1501_v26  ;;  %v1527_v59 = vmul.f32 0.0, %v1501_v26 }
 0x1b5   :  { %v1508_v1 = vmul.f32 %v1502_v43, %v1502_v43  ;;  %v1509_v5 = vmul.f32 %v1503_v18, %v1503_v18  ;;  %v1510_v6 = vmul.f32 %v1504_v19, %v1504_v19  ;;  %v1511_v22 = vmul.f32 %v1505_v56, %v1505_v56 }
 0x1b6   :  { %v1512_v11 = vmul.f32 %v1506_v37, %v1506_v37  ;;  %v1513_v36 = vmul.f32 %v1507_v2, %v1507_v2  ;;  %v1528_v44 = vmul.f32 %v1527_v59, %v1501_v26 }
 0x1b7   :  { %v1514_v33 = vsel %vm1486_vm0, %v1508_v1, 0.0  ;;  %v1515_v24 = vsel %vm1486_vm0, %v1509_v5, 0.0  ;;  %v1517_v15 = vsel %vm1486_vm0, %v1510_v6, 0.0  ;;  %v1519_v50 = vsel %vm1486_vm0, %v1511_v22, 0.0 }
 0x1b8   :  { %v1516_v34 = vadd.f32 %v1515_v24, %v1514_v33  ;;  %v1521_v14 = vsel %vm1486_vm0, %v1512_v11, 0.0  ;;  %v1523_v39 = vsel %vm1496_vm1, %v1513_v36, 0.0 }
 0x1ba   :  { %v1518_v9 = vadd.f32 %v1517_v15, %v1516_v34 }
 0x1bc   :  { %v1520_v21 = vadd.f32 %v1519_v50, %v1518_v9 }
 0x1be   :  { %v1522_v25 = vadd.f32 %v1521_v14, %v1520_v21 }
 0x1c0   :  { %v1524_v16 = vadd.f32 %v1523_v39, %v1522_v25 }
 0x1c2   :  { %1525 = vadd.xlane.f32.xlu0 %v1524_v16 }
 0x24b   :  { %v1526_v10 = vpop.xlane.xlu0 %1525 }
 0x24c   :  { %v1529_v52 = vadd.f32 %v1528_v44, %v1526_v10 }
 0x24e   :  { %v1530_v58 = vmul.f32 0.0015432099, %v1529_v52 }
 0x250   :  { %v1532_v40 = vadd.f32 1e-05, %v1530_v58 }
 0x252   :  { %1679 = vrsqrt.f32 %v1532_v40 }
 0x25f   :  { %v1680_v46 = vpop.eup %1679 }
 0x260   :  { %v1534_v49 = vmul.f32 %v1680_v46, %v1531_v41 }
 0x262   :  { %1540 = vperm.xlu1 %1677, %v1534_v49   ;;  %v1536_v62 = vmul.f32 %v1534_v49, %v1501_v26 }
 0x264   :  { %v1537_v51 = vsub.f32 %v1535_v38, %v1536_v62 }
 0x266   :  { %1551 = vperm.xlu0 %1678, %v1537_v51   ;;  %v1583_v60 = vmax.f32 %v1537_v51, 0.0 }
 0x268   :  { %1585 = vst.msk [vmem:[#allocation2] sm:$0xf] %vm1584_vm2, %v1583_v60 }
 0x269   :  { %1692 = shalt.err (!%p1689_p4)
}
 0x26a   :  { %1597 = dma.vmem_to_hbm [thread:$0]  %s1595_s6, 64, %s3105_s5, [#allocation3]   ;;  %vm1580_vm3 = vcmask 64516  }
 0x26b   :  { %vm1581_vm4 = vmor %vm1580_vm3, %vm1486_vm0 }
 0x2dd   :  { %v1541_v47 = vpop.permute.xlu1 %1540 }
 0x2de   :  { %v1543_v13 = vmul.f32 %v1541_v47, %v3039_v31  ;;  %v1544_v53 = vmul.f32 %v1541_v47, %v3041_v61  ;;  %v1545_v35 = vmul.f32 %v1541_v47, %v3043_v42  ;;  %v1546_v55 = vmul.f32 %v1541_v47, %v3045_v48 }
 0x2df   :  { %v1547_v29 = vmul.f32 %v1541_v47, %v3051_v57  ;;  %v1548_v28 = vmul.f32 %v1541_v47, %v3055_v30 }
 0x2e1   :  { %v1552_v0 = vpop.permute.xlu0 %1551 }
 0x2e2   :  { %v1554_v32 = vadd.f32 %v1552_v0, %v1543_v13  ;;  %v1555_v3 = vadd.f32 %v1552_v0, %v1544_v53  ;;  %v1556_v23 = vadd.f32 %v1552_v0, %v1545_v35  ;;  %v1557_v8 = vadd.f32 %v1552_v0, %v1546_v55 }
 0x2e3   :  { %v1558_v45 = vadd.f32 %v1552_v0, %v1547_v29  ;;  %v1559_v54 = vadd.f32 %v1552_v0, %v1548_v28 }
 0x2e4   :  { %v1560_v17 = vmax.f32 %v1554_v32, 0.0  ;;  %v1561_v31 = vmax.f32 %v1555_v3, 0.0  ;;  %v1562_v63 = vmax.f32 %v1556_v23, 0.0  ;;  %v1563_v61 = vmax.f32 %v1557_v8, 0.0 }
 0x2e5   :  { %v1564_v20 = vmax.f32 %v1558_v45, 0.0  ;;  %v1565_v42 = vmax.f32 %v1559_v54, 0.0 }
 0x2e6   :  { %v1572_v48 = vcombine.low %v1560_v17, %v1561_v31  ;;  %v1573_v57 = vcombine.low %v1562_v63, %v1563_v61 }
 0x2e7   :  { %v1574_v27 = vcombine.low %v1564_v20, %v1565_v42 }
 0x2e8   :  { %1578 = vst [vmem:[%s3104_s4] sm:$0xff] %v1572_v48  ;;  %1579 = vst [vmem:[%s3104_s4 + $0x8] sm:$0xff] %v1573_v57 }
 0x2e9   :  { %1582 = vst.msk [vmem:[%s3104_s4 + $0x10] sm:$0xff] %vm1581_vm4, %v1574_v27 }
 0x2ea   :  { %1701 = dma.done.wait [#allocation3], 64  }
 0x2eb   :  { %1702 = vsyncadd [#allocation3], 4294967232 }
 0x2ec   :  { %1603 = vsyncpa [#allocation3], 1 }

// kernel: c2f_v2_forward.7
= control target key start
LH: loop header
LB: loop body
LE: loop exit
PB: predicated region body
PF: predicated region fallthrough
CT: control target
= control target key end

     0   :  { %v621_v0 = vmov 2   ;;  %v622_v1 = vmov 0   ;;  %v623_v3 = vmov 3   ;;  %v624_v4 = vmov 1   ;;  %s1139_s1 = inlined_call_operand.vmem [shape: f32[8,12], index: 1, kind: input, shape index: {}]   ;;  %s1140_s0 = inlined_call_operand.vmem [shape: f32[12,648], index: 0, kind: input, shape index: {}]   ;;  %s1141_s2 = inlined_call_operand.vmem [shape: f32[8,1], index: 2, kind: input, shape index: {}]   ;;  %s1142_s3 = inlined_call_operand.vmem [shape: f32[8,1], index: 3, kind: input, shape index: {}]   ;;  %s1143_s5 = inlined_call_operand.vmem [shape: f32[8,1], index: 5, kind: output, shape index: {1}]   ;;  %s1144_s4 = inlined_call_operand.vmem [shape: f32[8,648], index: 4, kind: output, shape index: {0}]  }
   0x1   :  { %607 = vset.pattern.permute.xlu1 %v621_v0  ;;  %605 = vset.pattern.permute.xlu0 %v622_v1  ;;  %v31_v2 = vld [vmem:[%s1139_s1] sm:$0xff]  ;;  %v625_v5 = vmov 4   ;;  %v626_v6 = vmov 5   ;;  %v627_v7 = vmov 6   ;;  %v628_v8 = vmov 8   ;;  %v676_v17 = vld [vmem:[%s1140_s0 + $0x8] sm:$0xff] }
   0x2   :  { %108 = vperm.xlu1 %607, %v31_v2   ;;  %34 = vperm.xlu0 %605, %v31_v2   ;;  %v629_v9 = vmov 7   ;;  %v630_v10 = vmov 11   ;;  %v631_v11 = vmov 9   ;;  %v632_v12 = vmov 10   ;;  %v671_v16 = vld [vmem:[%s1140_s0] sm:$0xff]  ;;  %v681_v18 = vld [vmem:[%s1140_s0 + $0x10] sm:$0xff] }
   0x3   :  { %v37_v13 = vlaneseq  ;;  %v686_v19 = vld [vmem:[%s1140_s0 + $0x18] sm:$0xff]  ;;  %v693_v21 = vld [vmem:[%s1140_s0 + $0x20] sm:$0xff]  ;;  %v698_v22 = vld [vmem:[%s1140_s0 + $0x28] sm:$0xff]  ;;  %vm511_vm0 = vcmask 64512   ;;  %vm583_vm1 = vcmask 7168  }
   0x5   :  { %v38_v14 = vshrl.u32 %v37_v13, 7 }
   0x6   :  { %608 = vset.pattern.permute.xlu1 %v623_v3  ;;  %606 = vset.pattern.permute.xlu0 %v624_v4  ;;  %v794_v3 = vld [vmem:[%s1140_s0 + $0x38] sm:$0xf] }
   0x7   :  { %148 = vperm.xlu1 %608, %v31_v2   ;;  %68 = vperm.xlu0 %606, %v31_v2   ;;  %v666_v15 = vsub.s32 2, %v38_v14  ;;  %v688_v20 = vsub.s32 0, %v38_v14  ;;  %v700_v23 = vsub.s32 3, %v38_v14  ;;  %v702_v24 = vsub.s32 1, %v38_v14 }
   0x8   :  { %v704_v25 = vsub.s32 4, %v38_v14  ;;  %v728_v37 = vsub.s32 5, %v38_v14  ;;  %v752_v49 = vsub.s32 6, %v38_v14  ;;  %v768_v57 = vsub.s32 7, %v38_v14 }
   0x9   :  { %v114_v26 = vrot.slane %v671_v16, %v666_v15  ;;  %v118_v27 = vrot.slane %v676_v17, %v666_v15  ;;  %v122_v28 = vrot.slane %v681_v18, %v666_v15  ;;  %v126_v29 = vrot.slane %v686_v19, %v666_v15 }
   0xa   :  { %v130_v30 = vrot.slane %v693_v21, %v666_v15  ;;  %v134_v31 = vrot.slane %v698_v22, %v666_v15  ;;  %v40_v32 = vrot.slane %v671_v16, %v688_v20  ;;  %v44_v33 = vrot.slane %v676_v17, %v688_v20 }
   0xb   :  { %609 = vset.pattern.permute.xlu1 %v625_v5  ;;  %610 = vset.pattern.permute.xlu0 %v626_v6  ;;  %v48_v34 = vrot.slane %v681_v18, %v688_v20  ;;  %v52_v35 = vrot.slane %v686_v19, %v688_v20  ;;  %v56_v36 = vrot.slane %v693_v21, %v688_v20 }
   0xc   :  { %188 = vperm.xlu1 %609, %v31_v2   ;;  %228 = vperm.xlu0 %610, %v31_v2   ;;  %v60_v38 = vrot.slane %v698_v22, %v688_v20  ;;  %v154_v39 = vrot.slane %v671_v16, %v700_v23  ;;  %v158_v40 = vrot.slane %v676_v17, %v700_v23 }
   0xd   :  { %v162_v41 = vrot.slane %v681_v18, %v700_v23  ;;  %v166_v42 = vrot.slane %v686_v19, %v700_v23  ;;  %v170_v43 = vrot.slane %v693_v21, %v700_v23  ;;  %v174_v44 = vrot.slane %v698_v22, %v700_v23 }
   0xe   :  { %v74_v45 = vrot.slane %v671_v16, %v702_v24  ;;  %v78_v46 = vrot.slane %v676_v17, %v702_v24  ;;  %v82_v47 = vrot.slane %v681_v18, %v702_v24  ;;  %v86_v48 = vrot.slane %v686_v19, %v702_v24 }
   0xf   :  { %v90_v50 = vrot.slane %v693_v21, %v702_v24  ;;  %v94_v51 = vrot.slane %v698_v22, %v702_v24  ;;  %v194_v52 = vrot.slane %v671_v16, %v704_v25  ;;  %v198_v53 = vrot.slane %v676_v17, %v704_v25 }
  0x10   :  { %611 = vset.pattern.permute.xlu1 %v627_v7  ;;  %613 = vset.pattern.permute.xlu0 %v628_v8  ;;  %v202_v54 = vrot.slane %v681_v18, %v704_v25  ;;  %v206_v55 = vrot.slane %v686_v19, %v704_v25  ;;  %v210_v56 = vrot.slane %v693_v21, %v704_v25  ;;  %v807_v8 = vld [vmem:[%s1140_s0 + $0x40] sm:$0xf]  ;;  %v830_v7 = vld [vmem:[%s1140_s0 + $0x58] sm:$0xf] }
  0x11   :  { %268 = vperm.xlu1 %611, %v31_v2   ;;  %348 = vperm.xlu0 %613, %v31_v2  }
  0x15   :  { %612 = vset.pattern.permute.xlu1 %v629_v9  ;;  %616 = vset.pattern.permute.xlu0 %v630_v10  ;;  %v812_v9 = vld [vmem:[%s1140_s0 + $0x48] sm:$0xf]  ;;  %v817_v10 = vld [vmem:[%s1140_s0 + $0x50] sm:$0xf] }
  0x16   :  { %308 = vperm.xlu1 %612, %v31_v2   ;;  %468 = vperm.xlu0 %616, %v31_v2  }
  0x1a   :  { %614 = vset.pattern.permute.xlu1 %v631_v11  ;;  %618 = vset.pattern.permute.xlu0 %v622_v1 }
  0x1b   :  { %388 = vperm.xlu1 %614, %v31_v2  }
  0x1f   :  { %615 = vset.pattern.permute.xlu1 %v632_v12 }
  0x20   :  { %428 = vperm.xlu1 %615, %v31_v2   ;;  %v789_v2 = vld [vmem:[%s1140_s0 + $0x30] sm:$0xf] }
  0x24   :  { %617 = vset.pattern.permute.xlu1 %v622_v1 }
  0x7d   :  { %v109_v1 = vpop.permute.xlu1 %108  ;;  %v35_v5 = vpop.permute.xlu0 %34 }
  0x7e   :  { %v135_v14 = vmul.f32 %v114_v26, %v109_v1  ;;  %v136_v4 = vmul.f32 %v118_v27, %v109_v1  ;;  %v137_v12 = vmul.f32 %v122_v28, %v109_v1  ;;  %v138_v13 = vmul.f32 %v126_v29, %v109_v1 }
  0x7f   :  { %v139_v26 = vmul.f32 %v130_v30, %v109_v1  ;;  %v140_v27 = vmul.f32 %v134_v31, %v109_v1  ;;  %v61_v11 = vmul.f32 %v40_v32, %v35_v5  ;;  %v62_v28 = vmul.f32 %v44_v33, %v35_v5 }
  0x80   :  { %v63_v29 = vmul.f32 %v48_v34, %v35_v5  ;;  %v64_v30 = vmul.f32 %v52_v35, %v35_v5  ;;  %v65_v31 = vmul.f32 %v56_v36, %v35_v5  ;;  %v66_v32 = vmul.f32 %v60_v38, %v35_v5 }
  0x82   :  { %v149_v0 = vpop.permute.xlu1 %148  ;;  %v69_v6 = vpop.permute.xlu0 %68 }
  0x83   :  { %v175_v33 = vmul.f32 %v154_v39, %v149_v0  ;;  %v176_v34 = vmul.f32 %v158_v40, %v149_v0  ;;  %v177_v35 = vmul.f32 %v162_v41, %v149_v0  ;;  %v178_v36 = vmul.f32 %v166_v42, %v149_v0 }
  0x84   :  { %v95_v38 = vmul.f32 %v74_v45, %v69_v6  ;;  %v96_v39 = vmul.f32 %v78_v46, %v69_v6  ;;  %v97_v40 = vmul.f32 %v82_v47, %v69_v6  ;;  %v98_v41 = vmul.f32 %v86_v48, %v69_v6 }
  0x85   :  { %v99_v42 = vmul.f32 %v90_v50, %v69_v6  ;;  %v100_v45 = vmul.f32 %v94_v51, %v69_v6  ;;  %v179_v46 = vmul.f32 %v170_v43, %v149_v0  ;;  %v180_v47 = vmul.f32 %v174_v44, %v149_v0 }
  0x86   :  { %v101_v1 = vadd.f32 %v95_v38, %v61_v11  ;;  %v102_v5 = vadd.f32 %v96_v39, %v62_v28  ;;  %v103_v63 = vadd.f32 %v97_v40, %v63_v29  ;;  %v104_v48 = vadd.f32 %v98_v41, %v64_v30 }
  0x87   :  { %v105_v62 = vadd.f32 %v99_v42, %v65_v31  ;;  %v106_v61 = vadd.f32 %v100_v45, %v66_v32  ;;  %v189_v60 = vpop.permute.xlu1 %188  ;;  %v1151_v39 = vrot.slane %v698_v22, %v728_v37 }
  0x88   :  { %v141_v50 = vadd.f32 %v135_v14, %v101_v1  ;;  %v142_v59 = vadd.f32 %v136_v4, %v102_v5  ;;  %v215_v51 = vmul.f32 %v194_v52, %v189_v60  ;;  %v216_v43 = vmul.f32 %v198_v53, %v189_v60  ;;  %v229_v14 = vpop.permute.xlu0 %228 }
  0x89   :  { %v143_v6 = vadd.f32 %v137_v12, %v103_v63  ;;  %v144_v58 = vadd.f32 %v138_v13, %v104_v48  ;;  %v145_v44 = vadd.f32 %v139_v26, %v105_v62  ;;  %v146_v0 = vadd.f32 %v140_v27, %v106_v61 }
  0x8a   :  { %v181_v11 = vadd.f32 %v175_v33, %v141_v50  ;;  %v182_v28 = vadd.f32 %v176_v34, %v142_v59  ;;  %v217_v29 = vmul.f32 %v202_v54, %v189_v60  ;;  %v218_v4 = vmul.f32 %v206_v55, %v189_v60 }
  0x8b   :  { %v183_v52 = vadd.f32 %v177_v35, %v143_v6  ;;  %v184_v30 = vadd.f32 %v178_v36, %v144_v58  ;;  %v185_v31 = vadd.f32 %v179_v46, %v145_v44  ;;  %v186_v32 = vadd.f32 %v180_v47, %v146_v0 }
  0x8c   :  { %v219_v53 = vmul.f32 %v210_v56, %v189_v60  ;;  %v1145_v59 = vrot.slane %v698_v22, %v704_v25  ;;  %v221_v62 = vadd.f32 %v215_v51, %v181_v11  ;;  %v222_v63 = vadd.f32 %v216_v43, %v182_v28  ;;  %v269_v54 = vpop.permute.xlu1 %268 }
  0x8d   :  { %v223_v12 = vadd.f32 %v217_v29, %v183_v52  ;;  %v224_v13 = vadd.f32 %v218_v4, %v184_v30  ;;  %v1146_v55 = vrot.slane %v671_v16, %v728_v37  ;;  %v1147_v58 = vrot.slane %v676_v17, %v728_v37 }
  0x8e   :  { %v220_v61 = vmul.f32 %v1145_v59, %v189_v60  ;;  %v225_v33 = vadd.f32 %v219_v53, %v185_v31  ;;  %v1148_v56 = vrot.slane %v681_v18, %v728_v37  ;;  %v1149_v60 = vrot.slane %v686_v19, %v728_v37 }
  0x8f   :  { %v255_v26 = vmul.f32 %v1146_v55, %v229_v14  ;;  %v256_v27 = vmul.f32 %v1147_v58, %v229_v14  ;;  %v1150_v36 = vrot.slane %v693_v21, %v728_v37  ;;  %v260_v40 = vmul.f32 %v1151_v39, %v229_v14 }
  0x90   :  { %v226_v34 = vadd.f32 %v220_v61, %v186_v32  ;;  %v257_v25 = vmul.f32 %v1148_v56, %v229_v14  ;;  %v258_v35 = vmul.f32 %v1149_v60, %v229_v14  ;;  %v1152_v47 = vrot.slane %v671_v16, %v752_v49 }
  0x91   :  { %v259_v38 = vmul.f32 %v1150_v36, %v229_v14  ;;  %v261_v41 = vadd.f32 %v255_v26, %v221_v62  ;;  %v262_v42 = vadd.f32 %v256_v27, %v222_v63  ;;  %v1153_v5 = vrot.slane %v676_v17, %v752_v49  ;;  %v309_v0 = vpop.permute.xlu1 %308  ;;  %v349_v62 = vpop.permute.xlu0 %348 }
  0x92   :  { %v263_v45 = vadd.f32 %v257_v25, %v223_v12  ;;  %v264_v46 = vadd.f32 %v258_v35, %v224_v13  ;;  %v295_v1 = vmul.f32 %v1152_v47, %v269_v54  ;;  %v266_v51 = vadd.f32 %v260_v40, %v226_v34 }
  0x93   :  { %v296_v48 = vmul.f32 %v1153_v5, %v269_v54  ;;  %v265_v50 = vadd.f32 %v259_v38, %v225_v33  ;;  %v1154_v43 = vrot.slane %v681_v18, %v752_v49  ;;  %v1155_v37 = vrot.slane %v686_v19, %v752_v49 }
  0x94   :  { %v1156_v11 = vrot.slane %v693_v21, %v752_v49  ;;  %v1157_v29 = vrot.slane %v698_v22, %v752_v49  ;;  %v301_v14 = vadd.f32 %v295_v1, %v261_v41  ;;  %v1158_v32 = vrot.slane %v671_v16, %v768_v57 }
  0x95   :  { %v297_v6 = vmul.f32 %v1154_v43, %v269_v54  ;;  %v298_v44 = vmul.f32 %v1155_v37, %v269_v54  ;;  %v302_v52 = vadd.f32 %v296_v48, %v262_v42  ;;  %v1159_v59 = vrot.slane %v676_v17, %v768_v57  ;;  %v469_v43 = vpop.permute.xlu0 %468 }
  0x96   :  { %v299_v28 = vmul.f32 %v1156_v11, %v269_v54  ;;  %v300_v4 = vmul.f32 %v1157_v29, %v269_v54  ;;  %v335_v53 = vmul.f32 %v1158_v32, %v309_v0  ;;  %v1160_v13 = vrot.slane %v681_v18, %v768_v57  ;;  %v389_v35 = vpop.permute.xlu1 %388 }
  0x97   :  { %v303_v30 = vadd.f32 %v297_v6, %v263_v45  ;;  %v304_v31 = vadd.f32 %v298_v44, %v264_v46  ;;  %v336_v61 = vmul.f32 %v1159_v59, %v309_v0  ;;  %v1161_v54 = vrot.slane %v686_v19, %v768_v57 }
  0x98   :  { %v305_v63 = vadd.f32 %v299_v28, %v265_v50  ;;  %v306_v12 = vadd.f32 %v300_v4, %v266_v51  ;;  %v337_v49 = vmul.f32 %v1160_v13, %v309_v0  ;;  %v1162_v26 = vrot.slane %v693_v21, %v768_v57 }
  0x99   :  { %v338_v55 = vmul.f32 %v1161_v54, %v309_v0  ;;  %v1163_v58 = vrot.slane %v698_v22, %v768_v57  ;;  %v341_v27 = vadd.f32 %v335_v53, %v301_v14  ;;  %v342_v33 = vadd.f32 %v336_v61, %v302_v52 }
  0x9a   :  { %v339_v16 = vmul.f32 %v1162_v26, %v309_v0  ;;  %v343_v34 = vadd.f32 %v337_v49, %v303_v30  ;;  %v1164_v18 = vrot.slane %v789_v2, %v688_v20  ;;  %v1165_v19 = vrot.slane %v794_v3, %v688_v20 }
  0x9b   :  { %v340_v17 = vmul.f32 %v1163_v58, %v309_v0  ;;  %v344_v56 = vadd.f32 %v338_v55, %v304_v31  ;;  %v1166_v21 = vrot.slane %v807_v8, %v688_v20  ;;  %v1167_v22 = vrot.slane %v812_v9, %v688_v20  ;;  %v429_v32 = vpop.permute.xlu1 %428 }
  0x9c   :  { %v375_v25 = vmul.f32 %v1164_v18, %v349_v62  ;;  %v376_v60 = vmul.f32 %v1165_v19, %v349_v62  ;;  %v345_v36 = vadd.f32 %v339_v16, %v305_v63  ;;  %v494_v39 = vrot.slane %v830_v7, %v700_v23 }
  0x9d   :  { %v377_v38 = vmul.f32 %v1166_v21, %v349_v62  ;;  %v378_v57 = vmul.f32 %v1167_v22, %v349_v62  ;;  %v346_v40 = vadd.f32 %v340_v17, %v306_v12  ;;  %v1168_v41 = vrot.slane %v817_v10, %v688_v20 }
  0x9e   :  { %v381_v45 = vadd.f32 %v375_v25, %v341_v27  ;;  %v382_v46 = vadd.f32 %v376_v60, %v342_v33  ;;  %v1169_v5 = vrot.slane %v789_v2, %v702_v24  ;;  %v1170_v50 = vrot.slane %v794_v3, %v702_v24 }
  0x9f   :  { %v379_v42 = vmul.f32 %v1168_v41, %v349_v62  ;;  %v383_v47 = vadd.f32 %v377_v38, %v343_v34  ;;  %v384_v1 = vadd.f32 %v378_v57, %v344_v56  ;;  %v1171_v6 = vrot.slane %v830_v7, %v688_v20 }
  0xa0   :  { %v415_v48 = vmul.f32 %v1169_v5, %v389_v35  ;;  %v416_v51 = vmul.f32 %v1170_v50, %v389_v35  ;;  %v1172_v0 = vrot.slane %v807_v8, %v702_v24  ;;  %v1173_v28 = vrot.slane %v812_v9, %v702_v24 }
  0xa1   :  { %v380_v37 = vmul.f32 %v1171_v6, %v349_v62  ;;  %v385_v44 = vadd.f32 %v379_v42, %v345_v36  ;;  %v1174_v4 = vrot.slane %v817_v10, %v702_v24  ;;  %v1175_v52 = vrot.slane %v830_v7, %v702_v24 }
  0xa2   :  { %v417_v11 = vmul.f32 %v1172_v0, %v389_v35  ;;  %v418_v29 = vmul.f32 %v1173_v28, %v389_v35  ;;  %v421_v31 = vadd.f32 %v415_v48, %v381_v45  ;;  %v422_v20 = vadd.f32 %v416_v51, %v382_v46 }
  0xa3   :  { %v419_v14 = vmul.f32 %v1174_v4, %v389_v35  ;;  %v420_v30 = vmul.f32 %v1175_v52, %v389_v35  ;;  %v1176_v59 = vrot.slane %v789_v2, %v666_v15  ;;  %v1177_v62 = vrot.slane %v794_v3, %v666_v15 }
  0xa4   :  { %v423_v53 = vadd.f32 %v417_v11, %v383_v47  ;;  %v1178_v12 = vrot.slane %v789_v2, %v700_v23  ;;  %v424_v49 = vadd.f32 %v418_v29, %v384_v1  ;;  %v1179_v24 = vrot.slane %v807_v8, %v666_v15 }
  0xa5   :  { %v455_v61 = vmul.f32 %v1176_v59, %v429_v32  ;;  %v456_v63 = vmul.f32 %v1177_v62, %v429_v32  ;;  %v1180_v55 = vrot.slane %v812_v9, %v666_v15  ;;  %v1181_v16 = vrot.slane %v794_v3, %v700_v23 }
  0xa6   :  { %v495_v13 = vmul.f32 %v1178_v12, %v469_v43  ;;  %v457_v54 = vmul.f32 %v1179_v24, %v429_v32  ;;  %v1182_v17 = vrot.slane %v817_v10, %v666_v15  ;;  %v1183_v34 = vrot.slane %v807_v8, %v700_v23  ;;  %v541_v24 = vld [vmem:[%s1141_s2] sm:$0xff] }
  0xa7   :  { %v458_v26 = vmul.f32 %v1180_v55, %v429_v32  ;;  %v496_v58 = vmul.f32 %v1181_v16, %v469_v43  ;;  %v461_v33 = vadd.f32 %v455_v61, %v421_v31  ;;  %v462_v2 = vadd.f32 %v456_v63, %v422_v20 }
  0xa8   :  { %v459_v27 = vmul.f32 %v1182_v17, %v429_v32  ;;  %v497_v56 = vmul.f32 %v1183_v34, %v469_v43  ;;  %v463_v18 = vadd.f32 %v457_v54, %v423_v53  ;;  %v1184_v25 = vrot.slane %v812_v9, %v700_v23 }
  0xa9   :  { %v386_v60 = vadd.f32 %v380_v37, %v346_v40  ;;  %v1185_v3 = vrot.slane %v830_v7, %v666_v15  ;;  %v1096_v36 = vadd.f32 %v495_v13, %v461_v33  ;;  %v1098_v21 = vadd.f32 %v496_v58, %v462_v2 }
  0xaa   :  { %v498_v19 = vmul.f32 %v1184_v25, %v469_v43  ;;  %v425_v38 = vadd.f32 %v419_v14, %v385_v44  ;;  %v464_v22 = vadd.f32 %v458_v26, %v424_v49  ;;  %v500_v41 = vmul.f32 %v494_v39, %v469_v43  ;;  %v545_v26 = vld [vmem:[%s1142_s3] sm:$0xff] }
  0xab   :  { %v460_v35 = vmul.f32 %v1185_v3, %v429_v32  ;;  %v426_v57 = vadd.f32 %v420_v30, %v386_v60  ;;  %v1186_v42 = vrot.slane %v817_v10, %v700_v23  ;;  %v503_v9 = vadd.f32 %v497_v56, %v463_v18 }
  0xac   :  { %v465_v8 = vadd.f32 %v459_v27, %v425_v38  ;;  %v507_v40 = vadd.f32 %v1098_v21, %v1096_v36  ;;  %v504_v15 = vadd.f32 %v498_v19, %v464_v22 }
  0xad   :  { %v499_v45 = vmul.f32 %v1186_v42, %v469_v43  ;;  %v466_v46 = vadd.f32 %v460_v35, %v426_v57 }
  0xae   :  { %v508_v7 = vadd.f32 %v507_v40, %v503_v9 }
  0xaf   :  { %v506_v47 = vadd.f32 %v500_v41, %v466_v46  ;;  %v505_v1 = vadd.f32 %v499_v45, %v465_v8 }
  0xb0   :  { %v509_v5 = vadd.f32 %v508_v7, %v504_v15 }
  0xb1   :  { %v512_v50 = vsel %vm511_vm0, %v506_v47, 0.0 }
  0xb2   :  { %v510_v48 = vadd.f32 %v509_v5, %v505_v1 }
  0xb4   :  { %v513_v39 = vadd.f32 %v512_v50, %v510_v48 }
  0xb6   :  { %514 = vadd.xlane.f32.xlu1 %v513_v39 }
 0x13f   :  { %v515_v51 = vpop.xlane.xlu1 %514 }
 0x140   :  { %v516_v6 = vmul.f32 0.00125, %v515_v51 }
 0x142   :  { %v517_v23 = vsub.f32 %v1096_v36, %v516_v6  ;;  %v518_v10 = vsub.f32 %v1098_v21, %v516_v6  ;;  %v519_v43 = vsub.f32 %v503_v9, %v516_v6  ;;  %v520_v37 = vsub.f32 %v504_v15, %v516_v6 }
 0x143   :  { %v522_v11 = vsub.f32 %v506_v47, %v516_v6  ;;  %v521_v28 = vsub.f32 %v505_v1, %v516_v6  ;;  %v537_v61 = vmul.f32 152.0, %v516_v6 }
 0x144   :  { %v523_v44 = vmul.f32 %v517_v23, %v517_v23  ;;  %v524_v0 = vmul.f32 %v518_v10, %v518_v10  ;;  %v525_v29 = vmul.f32 %v519_v43, %v519_v43  ;;  %v526_v14 = vmul.f32 %v520_v37, %v520_v37 }
 0x145   :  { %v528_v30 = vmul.f32 %v522_v11, %v522_v11  ;;  %v527_v31 = vmul.f32 %v521_v28, %v521_v28  ;;  %v538_v62 = vmul.f32 %v537_v61, %v516_v6 }
 0x146   :  { %v529_v4 = vadd.f32 %v524_v0, %v523_v44 }
 0x147   :  { %v533_v53 = vsel %vm511_vm0, %v528_v30, 0.0 }
 0x148   :  { %v530_v52 = vadd.f32 %v529_v4, %v525_v29 }
 0x14a   :  { %v531_v20 = vadd.f32 %v530_v52, %v526_v14 }
 0x14c   :  { %v532_v32 = vadd.f32 %v531_v20, %v527_v31 }
 0x14e   :  { %v534_v59 = vadd.f32 %v533_v53, %v532_v32 }
 0x150   :  { %535 = vadd.xlane.f32.xlu0 %v534_v59 }
 0x1d9   :  { %v536_v63 = vpop.xlane.xlu0 %535 }
 0x1da   :  { %v539_v12 = vadd.f32 %v538_v62, %v536_v63 }
 0x1dc   :  { %v540_v13 = vmul.f32 0.00125, %v539_v12 }
 0x1de   :  { %v542_v49 = vadd.f32 1e-05, %v540_v13 }
 0x1e0   :  { %619 = vrsqrt.f32 %v542_v49 }
 0x1ed   :  { %v620_v54 = vpop.eup %619 }
 0x1ee   :  { %v544_v55 = vmul.f32 %v620_v54, %v541_v24 }
 0x1f0   :  { %550 = vperm.xlu1 %617, %v544_v55   ;;  %v546_v16 = vmul.f32 %v544_v55, %v516_v6 }
 0x1f2   :  { %v547_v58 = vsub.f32 %v545_v26, %v546_v16 }
 0x1f4   :  { %561 = vperm.xlu0 %618, %v547_v58   ;;  %v582_v17 = vmax.f32 %v547_v58, 0.0 }
 0x1f6   :  { %584 = vst.msk [vmem:[%s1143_s5] sm:$0xff] %vm583_vm1, %v582_v17 }
 0x26b   :  { %v551_v27 = vpop.permute.xlu1 %550 }
 0x26c   :  { %v553_v33 = vmul.f32 %v551_v27, %v1096_v36  ;;  %v554_v2 = vmul.f32 %v551_v27, %v1098_v21  ;;  %v555_v34 = vmul.f32 %v551_v27, %v503_v9  ;;  %v556_v56 = vmul.f32 %v551_v27, %v504_v15 }
 0x26d   :  { %v557_v18 = vmul.f32 %v551_v27, %v505_v1  ;;  %v558_v25 = vmul.f32 %v551_v27, %v506_v47 }
 0x26f   :  { %v562_v19 = vpop.permute.xlu0 %561 }
 0x270   :  { %v564_v60 = vadd.f32 %v562_v19, %v553_v33  ;;  %v565_v3 = vadd.f32 %v562_v19, %v554_v2  ;;  %v566_v35 = vadd.f32 %v562_v19, %v555_v34  ;;  %v567_v38 = vadd.f32 %v562_v19, %v556_v56 }
 0x271   :  { %v568_v22 = vadd.f32 %v562_v19, %v557_v18  ;;  %v569_v57 = vadd.f32 %v562_v19, %v558_v25 }
 0x272   :  { %v570_v41 = vmax.f32 %v564_v60, 0.0  ;;  %v571_v8 = vmax.f32 %v565_v3, 0.0  ;;  %v572_v42 = vmax.f32 %v566_v35, 0.0  ;;  %v573_v45 = vmax.f32 %v567_v38, 0.0 }
 0x273   :  { %v574_v40 = vmax.f32 %v568_v22, 0.0  ;;  %v575_v46 = vmax.f32 %v569_v57, 0.0 }
 0x274   :  { %576 = vst [vmem:[%s1144_s4] sm:$0xff] %v570_v41  ;;  %577 = vst [vmem:[%s1144_s4 + $0x8] sm:$0xff] %v571_v8 }
 0x275   :  { %578 = vst [vmem:[%s1144_s4 + $0x10] sm:$0xff] %v572_v42  ;;  %579 = vst [vmem:[%s1144_s4 + $0x18] sm:$0xff] %v573_v45 }
 0x276   :  { %580 = vst [vmem:[%s1144_s4 + $0x20] sm:$0xff] %v574_v40  ;;  %581 = vst.msk [vmem:[%s1144_s4 + $0x28] sm:$0xff] %vm511_vm0, %v575_v46 }

</bundles_post_ra>
